<compile_context>
chip_gen: v7x
topology: tpu7x:2x2x1
jax: 0.10.0
libtpu: 0.0.40
codegen_flags: <defaults>
</compile_context>

<pallas_src>
import jax
import jax.numpy as jnp
from jax import lax
from jax.experimental import pallas as pl
from jax.experimental.pallas import tpu as pltpu

LANE = 128  # TPU lane width


def _round_up(x, m):
    return (x + m - 1) // m * m


def _make_kernel(KH, KW, TH, TH_in, W_out, stride, Cin_p, Cout_p, Cout_store,
                 activation, out_dtype, fuse_taps):
    M = TH * W_out
    K = KH * KW * Cin_p

    def kernel(x_hbm, w_ref, b_ref, a_ref, o_ref, *scratch):
        if fuse_taps:
            xbuf, lhs_buf, sem = scratch
        else:
            xbuf, sem = scratch

        n = pl.program_id(0)
        i = pl.program_id(1)
        num_h = pl.num_programs(1)
        slot = i % 2

        # Scalar reads / index math before any DMA wait (keeps SMEM sst->sld
        # forwarding alive).
        alpha = a_ref[0]

        def start_strip(row_tile, dst_slot):
            row0 = row_tile * (TH * stride)
            pltpu.make_async_copy(x_hbm.at[n, pl.ds(row0, TH_in)],
                                  xbuf.at[dst_slot], sem.at[dst_slot]).start()

        # Prime the pipeline on the first row tile of this image, then always
        # prefetch the next strip before computing on the current one.
        @pl.when(i == 0)
        def _():
            start_strip(i, slot)

        @pl.when(i + 1 < num_h)
        def _():
            start_strip(i + 1, 1 - slot)

        # Wait for the current strip (started one step earlier, or just above
        # for the first tile of this image).
        pltpu.make_async_copy(x_hbm.at[n, pl.ds(i * TH * stride, TH_in)],
                              xbuf.at[slot], sem.at[slot]).wait()

        def tap_patch(kh, kw):
            if stride == 1:
                p = xbuf[slot, kh:kh + TH, kw:kw + W_out, :]
            else:
                # Strided ref load: no full-strip materialization, no XLU
                # relayout of a huge value.
                p = xbuf[slot,
                         pl.ds(kh, TH, stride=stride),
                         pl.ds(kw, W_out, stride=stride), :]
            return p.reshape(M, Cin_p)

        if fuse_taps:
            # im2col slab (one lane-aligned Cin_p block per tap) -> a single
            # MXU contraction with K = KH*KW*Cin_p (good on v6e/v7x 256-wide
            # MXUs).  Every column is overwritten each step, no init needed.
            for kh in range(KH):
                for kw in range(KW):
                    t = kh * KW + kw
                    lhs_buf[:, t * Cin_p:(t + 1) * Cin_p] = tap_patch(kh, kw)
            y = jnp.dot(lhs_buf[...], w_ref[...],
                        preferred_element_type=jnp.float32)
        else:
            # Per-tap accumulation (v5e): K = Cin_p = 128 per dot already
            # fills the 128-wide MXU; skips the slab store/load traffic.
            y = jnp.zeros((M, Cout_p), jnp.float32)
            for kh in range(KH):
                for kw in range(KW):
                    t = kh * KW + kw
                    y = y + jnp.dot(tap_patch(kh, kw),
                                    w_ref[t * Cin_p:(t + 1) * Cin_p, :],
                                    preferred_element_type=jnp.float32)

        y = y + b_ref[...]                      # conv bias + folded BN shift

        if activation == 'prelu':
            y = jnp.where(y > 0, y, alpha * y)
        elif activation == 'leakyrelu':
            y = jnp.where(y > 0, y, 0.2 * y)
        elif activation == 'tanh':
            y = jnp.tanh(y)

        if Cout_store < Cout_p:
            y = y[:, :Cout_store]               # small-Cout: unpadded store
        o_ref[0] = y.astype(out_dtype)          # (M, Cout_store), no reshape

    return kernel


def _vmem_budget():
    """(vmem_limit_bytes, tiling_budget_bytes) sized per chip generation."""
    cap = 64 << 20                               # conservative v7x fallback
    try:
        cap = int(getattr(pltpu.get_tpu_info(), 'vmem_capacity_bytes', cap))
    except Exception:
        pass
    if cap >= (100 << 20):                       # v5e / v6e: 128 MiB physical
        return 96 << 20, 72 << 20
    return 56 << 20, 40 << 20                    # v7x: 64 MiB physical


def _pick_tile_h(H_out, W_out, Wp, Cin_p, Cout_p, Cout_store, KH, KW, stride,
                 c_bytes, o_bytes, fuse_taps, budget, tile_h):
    """Largest multiple-of-8 row tile whose working set fits the VMEM budget."""
    if H_out < 8:
        return H_out
    cap = min(H_out - H_out % 8, 64)
    if tile_h is not None:
        cap = min(cap, max(8, tile_h - tile_h % 8))
    K = KH * KW * Cin_p
    for cand in range(cap, 7, -8):
        th_in = (cand - 1) * stride + KH
        m = cand * W_out
        vmem = (2 * th_in * Wp * Cin_p * c_bytes          # double-buffered strip
                + (m * K * c_bytes if fuse_taps else 0)   # im2col slab
                + 2 * K * Cout_p * c_bytes                # weight buffers
                + 2 * m * Cout_store * o_bytes            # output blocks
                + 2 * m * Cout_p * 4)                     # f32 result / acc
        if vmem <= budget:
            return cand
    return 8


def conv_block_forward(x_nchw, weight_oihw, bias, *, stride=1, bn_params=None,
                       activation=None, prelu_a=0.25, tile_h=None,
                       compute_dtype=jnp.bfloat16, fuse_taps=True):
    """Forward pass of ConvolutionalBlock.

    x_nchw:      (N, Cin, H, W)
    weight_oihw: (Cout, Cin, KH, KW)   (PyTorch Conv2d layout, KH == KW)
    bias:        (Cout,)
    bn_params:   None, or dict(gamma, beta, mean, var, eps)
    activation:  None | 'prelu' | 'leakyrelu' | 'tanh'
    compute_dtype: MXU operand dtype (bfloat16 recommended on v6e/v7x)
    fuse_taps:   True -> one im2col contraction (v6e/v7x);
                 False -> per-tap accumulation (v5e)
    returns:     (N, Cout, H_out, W_out)
    """
    if activation is not None and activation not in ('prelu', 'leakyrelu',
                                                     'tanh'):
        raise ValueError(f"unsupported activation: {activation!r}")

    N, Cin, H, W = x_nchw.shape
    Cout, _, KH, KW = weight_oihw.shape
    pad = KH // 2                        # module passes an int kernel_size
    H_out = (H + 2 * pad - KH) // stride + 1
    W_out = (W + 2 * pad - KW) // stride + 1

    Cin_p = _round_up(Cin, LANE)
    Cout_p = _round_up(Cout, LANE)
    # Small-channel layers are memory bound: store the output with the real
    # channel count (masked vst) instead of a 128/Cout HBM write blowup.
    Cout_store = Cout if Cout < 64 else Cout_p

    out_dtype = x_nchw.dtype
    c_bytes = jnp.dtype(compute_dtype).itemsize
    o_bytes = jnp.dtype(out_dtype).itemsize
    Wp = W + 2 * pad

    vmem_limit, vmem_budget = _vmem_budget()
    TH = _pick_tile_h(H_out, W_out, Wp, Cin_p, Cout_p, Cout_store, KH, KW,
                      stride, c_bytes, o_bytes, fuse_taps, vmem_budget, tile_h)
    num_h = pl.cdiv(H_out, TH)
    H_out_p = num_h * TH                 # padded output rows (sliced later)
    TH_in = (TH - 1) * stride + KH       # input rows per strip (incl. halo)
    Hp = max(H + 2 * pad, (H_out_p - 1) * stride + KH)
    M = TH * W_out
    K = KH * KW * Cin_p

    # ---- wrapper glue: layout + padding + BN folding (no hot-path compute) --
    x = jnp.transpose(x_nchw, (0, 2, 3, 1)).astype(compute_dtype)     # NHWC
    x = jnp.pad(x, ((0, 0), (pad, Hp - H - pad), (pad, pad), (0, Cin_p - Cin)))

    w = jnp.transpose(weight_oihw, (2, 3, 1, 0))          # (KH, KW, Cin, Cout)
    if bn_params is not None:
        scale = bn_params['gamma'] / jnp.sqrt(bn_params['var'] + bn_params['eps'])
        shift = bn_params['beta'] - bn_params['mean'] * scale
        w = w * scale                       # fold BN scale into the weights
        b = bias * scale + shift
    else:
        b = bias
    w = jnp.pad(w, ((0, 0), (0, 0), (0, Cin_p - Cin), (0, Cout_p - Cout)))
    w2d = w.reshape(K, Cout_p).astype(compute_dtype)
    b2d = jnp.pad(b.astype(jnp.float32), (0, Cout_p - Cout)).reshape(1, Cout_p)
    alpha = jnp.full((1,), prelu_a, jnp.float32)

    kernel = _make_kernel(KH, KW, TH, TH_in, W_out, stride, Cin_p, Cout_p,
                          Cout_store, activation, out_dtype, fuse_taps)

    scratch = [pltpu.VMEM((2, TH_in, Wp, Cin_p), compute_dtype)]  # dbl-buf strip
    if fuse_taps:
        scratch.append(pltpu.VMEM((M, K), compute_dtype))         # im2col slab
    scratch.append(pltpu.SemaphoreType.DMA((2,)))

    out = pl.pallas_call(
        kernel,
        out_shape=jax.ShapeDtypeStruct((N, num_h * M, Cout_store), out_dtype),
        grid_spec=pltpu.PrefetchScalarGridSpec(
            num_scalar_prefetch=0,
            grid=(N, num_h),
            in_specs=[
                pl.BlockSpec(memory_space=pl.ANY),                  # x in HBM
                # Constant index maps -> weight/bias loaded once, kept resident.
                pl.BlockSpec((K, Cout_p), lambda n, i: (0, 0)),
                pl.BlockSpec((1, Cout_p), lambda n, i: (0, 0)),
                pl.BlockSpec(memory_space=pltpu.MemorySpace.SMEM),  # PReLU alpha
            ],
            out_specs=pl.BlockSpec((1, M, Cout_store), lambda n, i: (n, i, 0)),
            scratch_shapes=scratch,
        ),
        compiler_params=pltpu.CompilerParams(
            # The strip-prefetch chain needs the row-tile axis sequential per
            # core, so it is 'arbitrary'; batch is 'parallel' (v7x megacore).
            dimension_semantics=("parallel", "arbitrary"),
            vmem_limit_bytes=vmem_limit,
        ),
    )(x, w2d, b2d, alpha)

    out = out.reshape(N, H_out_p, W_out, Cout_store)[:, :H_out, :, :Cout]
    return jnp.transpose(out, (0, 3, 1, 2))               # back to NCHW


def _reference(x_nchw, weight_oihw, bias, *, stride, bn_params, activation,
               prelu_a):
    pad = weight_oihw.shape[2] // 2
    y = lax.conv_general_dilated(
        x_nchw, weight_oihw,
        window_strides=(stride, stride),
        padding=[(pad, pad), (pad, pad)],
        dimension_numbers=('NCHW', 'OIHW', 'NCHW'))
    y = y + bias[None, :, None, None]
    if bn_params is not None:
        scale = bn_params['gamma'] / jnp.sqrt(bn_params['var'] + bn_params['eps'])
        y = (y - bn_params['mean'][None, :, None, None]) * \
            scale[None, :, None, None] + bn_params['beta'][None, :, None, None]
    if activation == 'prelu':
        y = jnp.where(y > 0, y, prelu_a * y)
    elif activation == 'leakyrelu':
        y = jnp.where(y > 0, y, 0.2 * y)
    elif activation == 'tanh':
        y = jnp.tanh(y)
    return y


if __name__ == "__main__":
    key = jax.random.PRNGKey(0)
    ks = jax.random.split(key, 8)

    # small shapes consistent with the module: (N, in_channels, w, h)
    N, Cin, Cout, H, W, Ksz = 2, 4, 8, 16, 16, 3
    stride = 1
    activation = 'prelu'

    x = jax.random.normal(ks[0], (N, Cin, H, W), jnp.float32)
    weight = 0.1 * jax.random.normal(ks[1], (Cout, Cin, Ksz, Ksz), jnp.float32)
    bias = 0.1 * jax.random.normal(ks[2], (Cout,), jnp.float32)
    bn_params = dict(
        gamma=1.0 + 0.1 * jax.random.normal(ks[3], (Cout,), jnp.float32),
        beta=0.1 * jax.random.normal(ks[4], (Cout,), jnp.float32),
        mean=0.1 * jax.random.normal(ks[5], (Cout,), jnp.float32),
        var=0.5 + jnp.abs(jax.random.normal(ks[6], (Cout,), jnp.float32)),
        eps=1e-5,
    )
    prelu_a = 0.25  # PyTorch PReLU default init

    ref = _reference(x, weight, bias, stride=stride, bn_params=bn_params,
                     activation=activation, prelu_a=prelu_a)

    # 1) f32 operands (exactness check); tile_h=8 -> 2 row tiles so the
    #    double-buffered strip prefetch chain is actually exercised.
    out_f32 = conv_block_forward(x, weight, bias, stride=stride,
                                 bn_params=bn_params, activation=activation,
                                 prelu_a=prelu_a, tile_h=8,
                                 compute_dtype=jnp.float32)
    out_f32 = jax.block_until_ready(out_f32)
    assert out_f32.shape == (N, Cout, H, W), out_f32.shape
    assert jnp.allclose(out_f32, ref, atol=1e-4, rtol=1e-4), \
        float(jnp.max(jnp.abs(out_f32 - ref)))

    # 2) bf16 operands (default fast path on v6e/v7x), fused-tap kernel.
    out_bf16 = conv_block_forward(x, weight, bias, stride=stride,
                                  bn_params=bn_params, activation=activation,
                                  prelu_a=prelu_a, tile_h=8)
    out_bf16 = jax.block_until_ready(out_bf16)
    assert out_bf16.shape == (N, Cout, H, W), out_bf16.shape
    assert jnp.allclose(out_bf16, ref, atol=5e-2, rtol=5e-2), \
        float(jnp.max(jnp.abs(out_bf16 - ref)))

    # 3) per-tap accumulation path (v5e variant).
    out_tap = conv_block_forward(x, weight, bias, stride=stride,
                                 bn_params=bn_params, activation=activation,
                                 prelu_a=prelu_a, tile_h=8, fuse_taps=False)
    out_tap = jax.block_until_ready(out_tap)
    assert out_tap.shape == (N, Cout, H, W), out_tap.shape
    assert jnp.allclose(out_tap, ref, atol=5e-2, rtol=5e-2), \
        float(jnp.max(jnp.abs(out_tap - ref)))

    print("KERNEL_OK")
</pallas_src>

<mosaic_0001>
module attributes {stable_mosaic.version = 11 : i64} {
  func.func @kernel(%arg0: i32, %arg1: i32, %arg2: memref<2x18x18x128xf32, #tpu.memory_space<any>>, %arg3: memref<1152x128xf32, #tpu.memory_space<vmem>>, %arg4: memref<1x128xf32, #tpu.memory_space<vmem>>, %arg5: memref<1xf32, #tpu.memory_space<smem>>, %arg6: memref<1x128x8xf32, #tpu.memory_space<vmem>>, %arg7: memref<2x10x18x128xf32, #tpu.memory_space<vmem>>, %arg8: memref<128x1152xf32, #tpu.memory_space<vmem>>, %arg9: memref<2x!tpu.dma_semaphore, #tpu.memory_space<semaphore_mem>>) attributes {dimension_semantics = [#tpu.dimension_semantics<parallel>, #tpu.dimension_semantics<arbitrary>], iteration_bounds = array<i64: 2, 2>, scalar_prefetch = 0 : i64, scratch_operands = 3 : i64, tpu.core_type = #tpu.core_type<tc>, window_params = [{}, {pipeline_mode = #tpu.pipeline_mode<synchronous>, transform_indices = @transform_1, window_bounds = array<i64: 1152, 128>}, {pipeline_mode = #tpu.pipeline_mode<synchronous>, transform_indices = @transform_2, window_bounds = array<i64: 1, 128>}, {transform_indices = @transform_3, window_bounds = array<i64: 1>}, {transform_indices = @transform_4, window_bounds = array<i64: 1, 128, 8>}]} {
    %c2_i32 = arith.constant 2 : i32
    %c0_i32 = arith.constant 0 : i32
    %0 = arith.cmpi eq, %c2_i32, %c0_i32 : i32
    %c1_i32 = arith.constant 1 : i32
    %1 = arith.select %0, %c1_i32, %c2_i32 : i32
    %2 = arith.remsi %arg1, %1 : i32
    %c0_i32_0 = arith.constant 0 : i32
    %3 = arith.cmpi ne, %2, %c0_i32_0 : i32
    %c0_i32_1 = arith.constant 0 : i32
    %4 = arith.cmpi slt, %2, %c0_i32_1 : i32
    %c0_i32_2 = arith.constant 0 : i32
    %5 = arith.cmpi slt, %1, %c0_i32_2 : i32
    %6 = arith.xori %4, %5 : i1
    %7 = arith.andi %6, %3 : i1
    %8 = arith.addi %2, %1 : i32
    %9 = arith.select %7, %8, %2 : i32
    %c0 = arith.constant 0 : index
    %10 = memref.load %arg5[%c0] : memref<1xf32, #tpu.memory_space<smem>>
    %c0_i32_3 = arith.constant 0 : i32
    %11 = arith.cmpi eq, %arg1, %c0_i32_3 : i32
    %12 = arith.extui %11 : i1 to i32
    %c0_i32_4 = arith.constant 0 : i32
    %13 = arith.cmpi ne, %12, %c0_i32_4 : i32
    scf.if %13 {
      %c8_i32_59 = arith.constant 8 : i32
      %86 = arith.muli %arg1, %c8_i32_59 : i32
      %c0_i32_60 = arith.constant 0 : i32
      %c0_i32_61 = arith.constant 0 : i32
      %87 = tpu.memref_slice %arg2[%arg0, %86, %c0_i32_60, %c0_i32_61] : memref<2x18x18x128xf32, #tpu.memory_space<any>> -> memref<1x10x18x128xf32, #tpu.memory_space<any>>
      %88 = tpu.memref_squeeze %87 : memref<1x10x18x128xf32, #tpu.memory_space<any>> -> memref<10x18x128xf32, #tpu.memory_space<any>>
      %c0_i32_62 = arith.constant 0 : i32
      %c0_i32_63 = arith.constant 0 : i32
      %c0_i32_64 = arith.constant 0 : i32
      %89 = tpu.memref_slice %arg7[%9, %c0_i32_62, %c0_i32_63, %c0_i32_64] : memref<2x10x18x128xf32, #tpu.memory_space<vmem>> -> memref<1x10x18x128xf32, #tpu.memory_space<vmem>>
      %90 = tpu.memref_squeeze %89 : memref<1x10x18x128xf32, #tpu.memory_space<vmem>> -> memref<10x18x128xf32, #tpu.memory_space<vmem>>
      %91 = tpu.memref_slice %arg9[%9] : memref<2x!tpu.dma_semaphore, #tpu.memory_space<semaphore_mem>> -> memref<1x!tpu.dma_semaphore, #tpu.memory_space<semaphore_mem>>
      %92 = tpu.memref_squeeze %91 : memref<1x!tpu.dma_semaphore, #tpu.memory_space<semaphore_mem>> -> memref<!tpu.dma_semaphore, #tpu.memory_space<semaphore_mem>>
      tpu.enqueue_dma source(%88 : memref<10x18x128xf32, #tpu.memory_space<any>>) target(%90 : memref<10x18x128xf32, #tpu.memory_space<vmem>>) target_semaphore(%92 : memref<!tpu.dma_semaphore, #tpu.memory_space<semaphore_mem>>)
    } else {
    }
    %c1_i32_5 = arith.constant 1 : i32
    %14 = arith.addi %arg1, %c1_i32_5 : i32
    %c2_i32_6 = arith.constant 2 : i32
    %15 = arith.cmpi slt, %14, %c2_i32_6 : i32
    %16 = arith.extui %15 : i1 to i32
    %c0_i32_7 = arith.constant 0 : i32
    %17 = arith.cmpi ne, %16, %c0_i32_7 : i32
    scf.if %17 {
      %c1_i32_59 = arith.constant 1 : i32
      %86 = arith.addi %arg1, %c1_i32_59 : i32
      %c1_i32_60 = arith.constant 1 : i32
      %87 = arith.subi %c1_i32_60, %9 : i32
      %c8_i32_61 = arith.constant 8 : i32
      %88 = arith.muli %86, %c8_i32_61 : i32
      %c0_i32_62 = arith.constant 0 : i32
      %c0_i32_63 = arith.constant 0 : i32
      %89 = tpu.memref_slice %arg2[%arg0, %88, %c0_i32_62, %c0_i32_63] : memref<2x18x18x128xf32, #tpu.memory_space<any>> -> memref<1x10x18x128xf32, #tpu.memory_space<any>>
      %90 = tpu.memref_squeeze %89 : memref<1x10x18x128xf32, #tpu.memory_space<any>> -> memref<10x18x128xf32, #tpu.memory_space<any>>
      %c0_i32_64 = arith.constant 0 : i32
      %c0_i32_65 = arith.constant 0 : i32
      %c0_i32_66 = arith.constant 0 : i32
      %91 = tpu.memref_slice %arg7[%87, %c0_i32_64, %c0_i32_65, %c0_i32_66] : memref<2x10x18x128xf32, #tpu.memory_space<vmem>> -> memref<1x10x18x128xf32, #tpu.memory_space<vmem>>
      %92 = tpu.memref_squeeze %91 : memref<1x10x18x128xf32, #tpu.memory_space<vmem>> -> memref<10x18x128xf32, #tpu.memory_space<vmem>>
      %93 = tpu.memref_slice %arg9[%87] : memref<2x!tpu.dma_semaphore, #tpu.memory_space<semaphore_mem>> -> memref<1x!tpu.dma_semaphore, #tpu.memory_space<semaphore_mem>>
      %94 = tpu.memref_squeeze %93 : memref<1x!tpu.dma_semaphore, #tpu.memory_space<semaphore_mem>> -> memref<!tpu.dma_semaphore, #tpu.memory_space<semaphore_mem>>
      tpu.enqueue_dma source(%90 : memref<10x18x128xf32, #tpu.memory_space<any>>) target(%92 : memref<10x18x128xf32, #tpu.memory_space<vmem>>) target_semaphore(%94 : memref<!tpu.dma_semaphore, #tpu.memory_space<semaphore_mem>>)
    } else {
    }
    %c8_i32 = arith.constant 8 : i32
    %18 = arith.muli %arg1, %c8_i32 : i32
    %c1_i32_8 = arith.constant 1 : i32
    %19 = arith.muli %18, %c1_i32_8 : i32
    %c0_i32_9 = arith.constant 0 : i32
    %c0_i32_10 = arith.constant 0 : i32
    %20 = tpu.memref_slice %arg2[%arg0, %19, %c0_i32_9, %c0_i32_10] : memref<2x18x18x128xf32, #tpu.memory_space<any>> -> memref<1x10x18x128xf32, #tpu.memory_space<any>>
    %21 = tpu.memref_squeeze %20 : memref<1x10x18x128xf32, #tpu.memory_space<any>> -> memref<10x18x128xf32, #tpu.memory_space<any>>
    %c0_i32_11 = arith.constant 0 : i32
    %c0_i32_12 = arith.constant 0 : i32
    %c0_i32_13 = arith.constant 0 : i32
    %22 = tpu.memref_slice %arg7[%9, %c0_i32_11, %c0_i32_12, %c0_i32_13] : memref<2x10x18x128xf32, #tpu.memory_space<vmem>> -> memref<1x10x18x128xf32, #tpu.memory_space<vmem>>
    %23 = tpu.memref_squeeze %22 : memref<1x10x18x128xf32, #tpu.memory_space<vmem>> -> memref<10x18x128xf32, #tpu.memory_space<vmem>>
    %24 = tpu.memref_slice %arg9[%9] : memref<2x!tpu.dma_semaphore, #tpu.memory_space<semaphore_mem>> -> memref<1x!tpu.dma_semaphore, #tpu.memory_space<semaphore_mem>>
    %25 = tpu.memref_squeeze %24 : memref<1x!tpu.dma_semaphore, #tpu.memory_space<semaphore_mem>> -> memref<!tpu.dma_semaphore, #tpu.memory_space<semaphore_mem>>
    tpu.wait_dma2 semaphore(%25 : memref<!tpu.dma_semaphore, #tpu.memory_space<semaphore_mem>>) src(%21 : memref<10x18x128xf32, #tpu.memory_space<any>>) dst(%23 : memref<10x18x128xf32, #tpu.memory_space<vmem>>)
    %26 = arith.index_cast %9 : i32 to index
    %c0_14 = arith.constant 0 : index
    %c0_15 = arith.constant 0 : index
    %c0_16 = arith.constant 0 : index
    %27 = vector.load %arg7[%26, %c0_14, %c0_15, %c0_16] : memref<2x10x18x128xf32, #tpu.memory_space<vmem>>, vector<1x8x16x128xf32>
    %28 = vector.shape_cast %27 : vector<1x8x16x128xf32> to vector<8x16x128xf32>
    %29 = vector.shape_cast %28 : vector<8x16x128xf32> to vector<128x128xf32>
    %c0_17 = arith.constant 0 : index
    %c0_18 = arith.constant 0 : index
    %30 = vector.load %arg8[%c0_17, %c0_18] : memref<128x1152xf32, #tpu.memory_space<vmem>>, vector<128x128xf32>
    tpu.vector_store %arg8[%c0_17, %c0_18], %29 {strides = array<i32>} : memref<128x1152xf32, #tpu.memory_space<vmem>>, vector<128x128xf32>,
    %31 = arith.index_cast %9 : i32 to index
    %c0_19 = arith.constant 0 : index
    %c1 = arith.constant 1 : index
    %c0_20 = arith.constant 0 : index
    %32 = vector.load %arg7[%31, %c0_19, %c1, %c0_20] : memref<2x10x18x128xf32, #tpu.memory_space<vmem>>, vector<1x8x16x128xf32>
    %33 = vector.shape_cast %32 : vector<1x8x16x128xf32> to vector<8x16x128xf32>
    %34 = vector.shape_cast %33 : vector<8x16x128xf32> to vector<128x128xf32>
    %c0_21 = arith.constant 0 : index
    %c128 = arith.constant 128 : index
    %35 = vector.load %arg8[%c0_21, %c128] : memref<128x1152xf32, #tpu.memory_space<vmem>>, vector<128x128xf32>
    tpu.vector_store %arg8[%c0_21, %c128], %34 {strides = array<i32>} : memref<128x1152xf32, #tpu.memory_space<vmem>>, vector<128x128xf32>,
    %36 = arith.index_cast %9 : i32 to index
    %c0_22 = arith.constant 0 : index
    %c2 = arith.constant 2 : index
    %c0_23 = arith.constant 0 : index
    %37 = vector.load %arg7[%36, %c0_22, %c2, %c0_23] : memref<2x10x18x128xf32, #tpu.memory_space<vmem>>, vector<1x8x16x128xf32>
    %38 = vector.shape_cast %37 : vector<1x8x16x128xf32> to vector<8x16x128xf32>
    %39 = vector.shape_cast %38 : vector<8x16x128xf32> to vector<128x128xf32>
    %c0_24 = arith.constant 0 : index
    %c256 = arith.constant 256 : index
    %40 = vector.load %arg8[%c0_24, %c256] : memref<128x1152xf32, #tpu.memory_space<vmem>>, vector<128x128xf32>
    tpu.vector_store %arg8[%c0_24, %c256], %39 {strides = array<i32>} : memref<128x1152xf32, #tpu.memory_space<vmem>>, vector<128x128xf32>,
    %41 = arith.index_cast %9 : i32 to index
    %c1_25 = arith.constant 1 : index
    %c0_26 = arith.constant 0 : index
    %c0_27 = arith.constant 0 : index
    %42 = vector.load %arg7[%41, %c1_25, %c0_26, %c0_27] : memref<2x10x18x128xf32, #tpu.memory_space<vmem>>, vector<1x8x16x128xf32>
    %43 = vector.shape_cast %42 : vector<1x8x16x128xf32> to vector<8x16x128xf32>
    %44 = vector.shape_cast %43 : vector<8x16x128xf32> to vector<128x128xf32>
    %c0_28 = arith.constant 0 : index
    %c384 = arith.constant 384 : index
    %45 = vector.load %arg8[%c0_28, %c384] : memref<128x1152xf32, #tpu.memory_space<vmem>>, vector<128x128xf32>
    tpu.vector_store %arg8[%c0_28, %c384], %44 {strides = array<i32>} : memref<128x1152xf32, #tpu.memory_space<vmem>>, vector<128x128xf32>,
    %46 = arith.index_cast %9 : i32 to index
    %c1_29 = arith.constant 1 : index
    %c1_30 = arith.constant 1 : index
    %c0_31 = arith.constant 0 : index
    %47 = vector.load %arg7[%46, %c1_29, %c1_30, %c0_31] : memref<2x10x18x128xf32, #tpu.memory_space<vmem>>, vector<1x8x16x128xf32>
    %48 = vector.shape_cast %47 : vector<1x8x16x128xf32> to vector<8x16x128xf32>
    %49 = vector.shape_cast %48 : vector<8x16x128xf32> to vector<128x128xf32>
    %c0_32 = arith.constant 0 : index
    %c512 = arith.constant 512 : index
    %50 = vector.load %arg8[%c0_32, %c512] : memref<128x1152xf32, #tpu.memory_space<vmem>>, vector<128x128xf32>
    tpu.vector_store %arg8[%c0_32, %c512], %49 {strides = array<i32>} : memref<128x1152xf32, #tpu.memory_space<vmem>>, vector<128x128xf32>,
    %51 = arith.index_cast %9 : i32 to index
    %c1_33 = arith.constant 1 : index
    %c2_34 = arith.constant 2 : index
    %c0_35 = arith.constant 0 : index
    %52 = vector.load %arg7[%51, %c1_33, %c2_34, %c0_35] : memref<2x10x18x128xf32, #tpu.memory_space<vmem>>, vector<1x8x16x128xf32>
    %53 = vector.shape_cast %52 : vector<1x8x16x128xf32> to vector<8x16x128xf32>
    %54 = vector.shape_cast %53 : vector<8x16x128xf32> to vector<128x128xf32>
    %c0_36 = arith.constant 0 : index
    %c640 = arith.constant 640 : index
    %55 = vector.load %arg8[%c0_36, %c640] : memref<128x1152xf32, #tpu.memory_space<vmem>>, vector<128x128xf32>
    tpu.vector_store %arg8[%c0_36, %c640], %54 {strides = array<i32>} : memref<128x1152xf32, #tpu.memory_space<vmem>>, vector<128x128xf32>,
    %56 = arith.index_cast %9 : i32 to index
    %c2_37 = arith.constant 2 : index
    %c0_38 = arith.constant 0 : index
    %c0_39 = arith.constant 0 : index
    %57 = vector.load %arg7[%56, %c2_37, %c0_38, %c0_39] : memref<2x10x18x128xf32, #tpu.memory_space<vmem>>, vector<1x8x16x128xf32>
    %58 = vector.shape_cast %57 : vector<1x8x16x128xf32> to vector<8x16x128xf32>
    %59 = vector.shape_cast %58 : vector<8x16x128xf32> to vector<128x128xf32>
    %c0_40 = arith.constant 0 : index
    %c768 = arith.constant 768 : index
    %60 = vector.load %arg8[%c0_40, %c768] : memref<128x1152xf32, #tpu.memory_space<vmem>>, vector<128x128xf32>
    tpu.vector_store %arg8[%c0_40, %c768], %59 {strides = array<i32>} : memref<128x1152xf32, #tpu.memory_space<vmem>>, vector<128x128xf32>,
    %61 = arith.index_cast %9 : i32 to index
    %c2_41 = arith.constant 2 : index
    %c1_42 = arith.constant 1 : index
    %c0_43 = arith.constant 0 : index
    %62 = vector.load %arg7[%61, %c2_41, %c1_42, %c0_43] : memref<2x10x18x128xf32, #tpu.memory_space<vmem>>, vector<1x8x16x128xf32>
    %63 = vector.shape_cast %62 : vector<1x8x16x128xf32> to vector<8x16x128xf32>
    %64 = vector.shape_cast %63 : vector<8x16x128xf32> to vector<128x128xf32>
    %c0_44 = arith.constant 0 : index
    %c896 = arith.constant 896 : index
    %65 = vector.load %arg8[%c0_44, %c896] : memref<128x1152xf32, #tpu.memory_space<vmem>>, vector<128x128xf32>
    tpu.vector_store %arg8[%c0_44, %c896], %64 {strides = array<i32>} : memref<128x1152xf32, #tpu.memory_space<vmem>>, vector<128x128xf32>,
    %66 = arith.index_cast %9 : i32 to index
    %c2_45 = arith.constant 2 : index
    %c2_46 = arith.constant 2 : index
    %c0_47 = arith.constant 0 : index
    %67 = vector.load %arg7[%66, %c2_45, %c2_46, %c0_47] : memref<2x10x18x128xf32, #tpu.memory_space<vmem>>, vector<1x8x16x128xf32>
    %68 = vector.shape_cast %67 : vector<1x8x16x128xf32> to vector<8x16x128xf32>
    %69 = vector.shape_cast %68 : vector<8x16x128xf32> to vector<128x128xf32>
    %c0_48 = arith.constant 0 : index
    %c1024 = arith.constant 1024 : index
    %70 = vector.load %arg8[%c0_48, %c1024] : memref<128x1152xf32, #tpu.memory_space<vmem>>, vector<128x128xf32>
    tpu.vector_store %arg8[%c0_48, %c1024], %69 {strides = array<i32>} : memref<128x1152xf32, #tpu.memory_space<vmem>>, vector<128x128xf32>,
    %c0_49 = arith.constant 0 : index
    %c0_50 = arith.constant 0 : index
    %71 = vector.load %arg8[%c0_49, %c0_50] : memref<128x1152xf32, #tpu.memory_space<vmem>>, vector<128x1152xf32>
    %c0_51 = arith.constant 0 : index
    %c0_52 = arith.constant 0 : index
    %72 = vector.load %arg3[%c0_51, %c0_52] : memref<1152x128xf32, #tpu.memory_space<vmem>>, vector<1152x128xf32>
    %cst = arith.constant dense<0.000000e+00> : vector<128x128xf32>
    %73 = tpu.matmul %71, %72, %cst {dimension_numbers = #tpu.dot_dimension_numbers<[1], [0], [0], [1], [0, 0, 1, 1], [], []>} : vector<128x1152xf32>, vector<1152x128xf32>, vector<128x128xf32> -> vector<128x128xf32>
    %c0_53 = arith.constant 0 : index
    %c0_54 = arith.constant 0 : index
    %74 = vector.load %arg4[%c0_53, %c0_54] : memref<1x128xf32, #tpu.memory_space<vmem>>, vector<1x128xf32>
    %75 = vector.broadcast %74 : vector<1x128xf32> to vector<128x128xf32>
    %76 = arith.addf %73, %75 : vector<128x128xf32>
    %cst_55 = arith.constant 0.000000e+00 : f32
    %77 = vector.broadcast %cst_55 : f32 to vector<128x128xf32>
    %78 = arith.cmpf ogt, %76, %77 : vector<128x128xf32>
    %79 = vector.broadcast %10 : f32 to vector<128x128xf32>
    %80 = arith.mulf %79, %76 : vector<128x128xf32>
    %81 = arith.select %78, %76, %80 : vector<128x128xi1>, vector<128x128xf32>
    %82 = vector.extract_strided_slice %81 {offsets = [0, 0], sizes = [128, 8], strides = [1, 1]} : vector<128x128xf32> to vector<128x8xf32>
    %c0_56 = arith.constant 0 : index
    %c0_57 = arith.constant 0 : index
    %c0_58 = arith.constant 0 : index
    %83 = vector.load %arg6[%c0_56, %c0_57, %c0_58] : memref<1x128x8xf32, #tpu.memory_space<vmem>>, vector<1x128x8xf32>
    %84 = vector.shape_cast %83 : vector<1x128x8xf32> to vector<128x8xf32>
    %85 = vector.shape_cast %82 : vector<128x8xf32> to vector<1x128x8xf32>
    tpu.vector_store %arg6[%c0_56, %c0_57, %c0_58], %85 {strides = array<i32>} : memref<1x128x8xf32, #tpu.memory_space<vmem>>, vector<1x128x8xf32>,
    return
  }
  func.func @transform_1(%arg0: i32, %arg1: i32) -> (i32, i32) {
    %c0_i32 = arith.constant 0 : i32
    %c0_i32_0 = arith.constant 0 : i32
    %c0_i32_1 = arith.constant 0 : i32
    return %c0_i32, %c0_i32_0 : i32, i32
  }
  func.func @transform_2(%arg0: i32, %arg1: i32) -> (i32, i32) {
    %c0_i32 = arith.constant 0 : i32
    %c0_i32_0 = arith.constant 0 : i32
    %c0_i32_1 = arith.constant 0 : i32
    return %c0_i32, %c0_i32_0 : i32, i32
  }
  func.func @transform_3(%arg0: i32, %arg1: i32) -> i32 {
    %c0_i32 = arith.constant 0 : i32
    %c0_i32_0 = arith.constant 0 : i32
    return %c0_i32 : i32
  }
  func.func @transform_4(%arg0: i32, %arg1: i32) -> (i32, i32, i32) {
    %c0_i32 = arith.constant 0 : i32
    %c0_i32_0 = arith.constant 0 : i32
    return %arg0, %arg1, %c0_i32 : i32, i32, i32
  }
}

</mosaic_0001>

<bundles_post_ra>
// kernel: tpu_custom_call.1
= control target key start
LH: loop header
LB: loop body
LE: loop exit
PB: predicated region body
PF: predicated region fallthrough
CT: control target
= control target key end

     0   :  { %s2874_s17 = smov 0   ;;  %s2876_s18 = smov 0   ;;  %s3961_s0 = inlined_call_operand.vmem [shape: f32[2,18,18,128], index: 0, kind: input, shape index: {}]   ;;  %s3962_s1 = inlined_call_operand.vmem [shape: f32[1152,128], index: 1, kind: input, shape index: {}]   ;;  %s3963_s2 = inlined_call_operand.vmem [shape: f32[1,128], index: 2, kind: input, shape index: {}]   ;;  %s3964_s3 = inlined_call_operand.<no memory space> [shape: f32[1], index: 3, kind: input, shape index: {}]   ;;  %s3965_s4 = inlined_call_operand.vmem [shape: f32[2,256,8], index: 4, kind: output, shape index: {}]  }
   0x1   :  { %9 = sst [smem:[#allocation5]] %s3964_s3  ;;  %s2878_s19 = smov 0  }
   0x2   :  { %s2880_s20 = smov 0   ;;  %s2882_s21 = smov 0  }
   0x3 LB: > { %s24_s3 = sadd.s32 1, %s2836_s19  ;;  %s27_s22 = sadd.s32 1, %s2840_s20  ;;  %s2844_s21 = sphi %s2882_s21, %s15_s21   ;;  %s2840_s20 = sphi %s2880_s20, %s3969_s20   ;;  %s2836_s19 = sphi %s2878_s19, %s3968_s19   ;;  %s2832_s18 = sphi %s2876_s18, %s3967_s18   ;;  %s2828_s17 = sphi %s2874_s17, %s3966_s17  }
   0x4   : > { %p25_p0 = scmp.ge.s32.totalorder %s24_s3, 2  ;;  %p1997_p1 = scmp.ge.s32.totalorder %s2844_s21, 1 }
   0x5   : > { %p143_p2 = scmp.lt.s32.totalorder %s2844_s21, 5 }
   0x6   : > { %s3971_s3 = smov (%p25_p0, %s24_s3), 0  ;;  %s3973_s22 = smov (!%p25_p0, %s27_s22), %s2840_s20 }
   0x7   : > { %p144_p3 = pnand %p1997_p1, %p143_p2  ;;  %p29_p4 = scmp.ge.s32.totalorder %s3973_s22, 2 }
   0x8   : > { %s1998_s23 = sshll.u32 (!%p144_p3), %s2828_s17, 4  ;;  %p167_p5 = scmp.lt.s32.totalorder (!%p144_p3), %s2832_s18, 1 }
   0x9   : > { %s3975_s22 = smov (%p29_p4, %s3973_s22), 0  ;;  %147 = sbr.rel (%p144_p3) target bundleno = 469 (0x1d5), region = 32 }
   0xa   : > { %p169_p6 = scmp.lt.s32.totalorder (!%p144_p3), %s1998_s23, 31  ;;  %p176_p7 = scmp.lt.s32.totalorder (!%p144_p3), %s2828_s17, 0 }
   0xb   : > { %s177_s26 = ssub.s32 (!%p144_p3), 0, %s2828_s17  ;;  %s2919_s9 = sld [smem:[#allocation5]] (!%p144_p3) }
   0xc   : > { %s2001_s28 = smin.u32 (!%p144_p3), %s2828_s17, %s177_s26  ;;  %p2004_p9 = scmp.ne.s32.totalorder (!%p144_p3), %s2828_s17, 0 }
   0xd   : > { %s179_s30 = sand.u32 (!%p144_p3), 1, %s2001_s28  }
   0xe   : > { %s180_s8 = ssub.s32 (!%p144_p3), 0, %s179_s30 }
  0x10   : > { %s168_s24 = scalar_select %p167_p5, %s2832_s18, 1 }
  0x11   : > { %s3977_s23 = smov (!%p169_p6, %s1998_s23), 31  ;;  %s3979_s8 = smov (!%p176_p7, %s180_s8), %s179_s30 }
  0x12   : > { %s1999_s25 = sshll.u32 %s168_s24, 5  ;;  %p2003_p8 = scmp.lt.s32.totalorder %s3979_s8, 0 }
  0x13   : > { %s172_s27 = sadd.s32 %s1999_s25, %s3977_s23  ;;  %s186_s10 = sadd.s32 2, %s3979_s8 }
  0x14   : > { %s2000_s29 = sshll.u32 %s172_s27, 3  ;;  %s3981_s10 = smov (!%p2003_p8, %s186_s10), %s3979_s8 }
  0x15   : > { %s2917_s7 = scalar_lea.vmem %s3965_s4, %s2000_s29  ;;  %192 = sbr.rel (%p2004_p9) target bundleno = 45 (0x2d), region = 36 }
  0x16   : > { %s2006_s11 = smul.u32 (!%p2004_p9), 192, %s2828_s17  ;;  %s200_s25 = scalar_lea.sflag (!%p2004_p9), [#allocation4], %s3981_s10 }
  0x17   : > { %s195_s12 = smul.u32 (!%p2004_p9), 432, %s2832_s18 }
  0x18   : > { %s198_s13 = smul.u32 (!%p2004_p9), 240, %s3981_s10 }
  0x19   : > { %s196_s14 = sadd.s32 (!%p2004_p9), %s2006_s11, %s195_s12 }
  0x1a   : > { %s2930_s23 = scalar_lea.vmem (!%p2004_p9), %s3961_s0, %s196_s14  ;;  %s2935_s24 = scalar_lea.vmem (!%p2004_p9), [#allocation2], %s198_s13 }
  0x1b   : > { %v256_v0 = vld [vmem:[%s2930_s23] sm:$0xff] (!%p2004_p9)  ;;  %v258_v1 = vld [vmem:[%s2930_s23 + $0x8] sm:$0xff] (!%p2004_p9)  ;;  %v260_v2 = vld [vmem:[%s2930_s23 + $0x18] sm:$0xff] (!%p2004_p9) }
  0x1c   : > { %257 = vst [vmem:[%s2935_s24] sm:$0xff] %v256_v0  ;;  %259 = vst [vmem:[%s2935_s24 + $0x8] sm:$0xff] %v258_v1  ;;  %v262_v3 = vld [vmem:[%s2930_s23 + $0x20] sm:$0xff]  ;;  %v264_v4 = vld [vmem:[%s2930_s23 + $0x30] sm:$0xff] }
  0x1d   : > { %261 = vst [vmem:[%s2935_s24 + $0x18] sm:$0xff] %v260_v2  ;;  %v266_v5 = vld [vmem:[%s2930_s23 + $0x38] sm:$0xff]  ;;  %263 = vst [vmem:[%s2935_s24 + $0x20] sm:$0xff] %v262_v3  ;;  %v268_v6 = vld [vmem:[%s2930_s23 + $0x48] sm:$0xff] }
  0x1e   : > { %265 = vst [vmem:[%s2935_s24 + $0x30] sm:$0xff] %v264_v4  ;;  %267 = vst [vmem:[%s2935_s24 + $0x38] sm:$0xff] %v266_v5  ;;  %v270_v7 = vld [vmem:[%s2930_s23 + $0x50] sm:$0xff]  ;;  %v272_v8 = vld [vmem:[%s2930_s23 + $0x60] sm:$0xff] }
  0x1f   : > { %269 = vst [vmem:[%s2935_s24 + $0x48] sm:$0xff] %v268_v6  ;;  %271 = vst [vmem:[%s2935_s24 + $0x50] sm:$0xff] %v270_v7  ;;  %v274_v9 = vld [vmem:[%s2930_s23 + $0x68] sm:$0xff]  ;;  %v276_v10 = vld [vmem:[%s2930_s23 + $0x78] sm:$0xff] }
  0x20   : > { %273 = vst [vmem:[%s2935_s24 + $0x60] sm:$0xff] %v272_v8  ;;  %v278_v11 = vld [vmem:[%s2930_s23 + $0x80] sm:$0xff]  ;;  %275 = vst [vmem:[%s2935_s24 + $0x68] sm:$0xff] %v274_v9  ;;  %v280_v12 = vld [vmem:[%s2930_s23 + $0x90] sm:$0xff] }
  0x21   : > { %277 = vst [vmem:[%s2935_s24 + $0x78] sm:$0xff] %v276_v10  ;;  %279 = vst [vmem:[%s2935_s24 + $0x80] sm:$0xff] %v278_v11  ;;  %v282_v13 = vld [vmem:[%s2930_s23 + $0x98] sm:$0xff]  ;;  %v284_v14 = vld [vmem:[%s2930_s23 + $0xa8] sm:$0xff] }
  0x22   : > { %281 = vst [vmem:[%s2935_s24 + $0x90] sm:$0xff] %v280_v12  ;;  %283 = vst [vmem:[%s2935_s24 + $0x98] sm:$0xff] %v282_v13  ;;  %v286_v15 = vld [vmem:[%s2930_s23 + $0xb0] sm:$0xff]  ;;  %v288_v16 = vld [vmem:[%s2930_s23 + $0xc0] sm:$0xff] }
  0x23   : > { %285 = vst [vmem:[%s2935_s24 + $0xa8] sm:$0xff] %v284_v14  ;;  %v290_v17 = vld [vmem:[%s2930_s23 + $0xc8] sm:$0xff]  ;;  %287 = vst [vmem:[%s2935_s24 + $0xb0] sm:$0xff] %v286_v15  ;;  %v292_v18 = vld [vmem:[%s2930_s23 + $0xd8] sm:$0xff] }
  0x24   : > { %289 = vst [vmem:[%s2935_s24 + $0xc0] sm:$0xff] %v288_v16  ;;  %291 = vst [vmem:[%s2935_s24 + $0xc8] sm:$0xff] %v290_v17  ;;  %v294_v19 = vld [vmem:[%s2930_s23 + $0xe0] sm:$0xff]  ;;  %v2007_v20 = vld [vmem:[%s2930_s23 + $0x10] sm:$0x3] }
  0x25   : > { %293 = vst [vmem:[%s2935_s24 + $0xd8] sm:$0xff] %v292_v18  ;;  %295 = vst [vmem:[%s2935_s24 + $0xe0] sm:$0xff] %v294_v19  ;;  %v2009_v21 = vld [vmem:[%s2930_s23 + $0x28] sm:$0x3]  ;;  %v2011_v22 = vld [vmem:[%s2930_s23 + $0x40] sm:$0x3] }
  0x26   : > { %2008 = vst [vmem:[%s2935_s24 + $0x10] sm:$0x3] %v2007_v20  ;;  %v2013_v23 = vld [vmem:[%s2930_s23 + $0x58] sm:$0x3]  ;;  %2010 = vst [vmem:[%s2935_s24 + $0x28] sm:$0x3] %v2009_v21 }
  0x27   : > { %2012 = vst [vmem:[%s2935_s24 + $0x40] sm:$0x3] %v2011_v22  ;;  %2014 = vst [vmem:[%s2935_s24 + $0x58] sm:$0x3] %v2013_v23  ;;  %v2015_v24 = vld [vmem:[%s2930_s23 + $0x70] sm:$0x3] }
  0x28   : > { %v2017_v25 = vld [vmem:[%s2930_s23 + $0x88] sm:$0x3]  ;;  %v2019_v26 = vld [vmem:[%s2930_s23 + $0xa0] sm:$0x3]  ;;  %2016 = vst [vmem:[%s2935_s24 + $0x70] sm:$0x3] %v2015_v24 }
  0x29   : > { %2018 = vst [vmem:[%s2935_s24 + $0x88] sm:$0x3] %v2017_v25  ;;  %2020 = vst [vmem:[%s2935_s24 + $0xa0] sm:$0x3] %v2019_v26  ;;  %v2021_v27 = vld [vmem:[%s2930_s23 + $0xb8] sm:$0x3] }
  0x2a   : > { %v2023_v28 = vld [vmem:[%s2930_s23 + $0xd0] sm:$0x3]  ;;  %v2025_v29 = vld [vmem:[%s2930_s23 + $0xe8] sm:$0x3]  ;;  %2022 = vst [vmem:[%s2935_s24 + $0xb8] sm:$0x3] %v2021_v27 }
  0x2b   : > { %2024 = vst [vmem:[%s2935_s24 + $0xd0] sm:$0x3] %v2023_v28  ;;  %2026 = vst [vmem:[%s2935_s24 + $0xe8] sm:$0x3] %v2025_v29 }
  0x2c   : > { %328 = vsyncadd %s200_s25, 2880 }
  0x2d PF: > { %s329_s26 = sadd.s32 1, %s2828_s17 }
  0x2e   : > { %p2027_p10 = scmp.ge.s32.totalorder %s329_s26, 2 }
  0x2f   : > { %s334_s27 = ssub.s32 (!%p2027_p10), 1, %s3981_s10  ;;  %s1916_s28 = smul.u32 (!%p2027_p10), 192, %s2828_s17 }
  0x30   : > { %333 = sbr.rel (%p2027_p10) target bundleno = 71 (0x47), region = 77 }
  0x31   : > { %s1917_s29 = smul.u32 (!%p2027_p10), 432, %s2832_s18  ;;  %s342_s18 = scalar_lea.sflag (!%p2027_p10), [#allocation4], %s334_s27 }
  0x32   : > { %s340_s30 = smul.u32 (!%p2027_p10), 240, %s334_s27 }
  0x33   : > { %s1918_s5 = sadd.s32 (!%p2027_p10), %s1917_s29, %s1916_s28 }
  0x34   : > { %s3004_s11 = scalar_lea.vmem (!%p2027_p10), %s3961_s0, %s1918_s5  ;;  %s3009_s17 = scalar_lea.vmem (!%p2027_p10), [#allocation2], %s340_s30 }
  0x35   : > { %v2029_v30 = vld [vmem:[%s3004_s11 + $0xc0] sm:$0xff] (!%p2027_p10)  ;;  %v2030_v31 = vld [vmem:[%s3004_s11 + $0xc8] sm:$0xff] (!%p2027_p10)  ;;  %v2031_v32 = vld [vmem:[%s3004_s11 + $0xd8] sm:$0xff] (!%p2027_p10) }
  0x36   : > { %399 = vst [vmem:[%s3009_s17] sm:$0xff] (!%p2027_p10), %v2029_v30  ;;  %401 = vst [vmem:[%s3009_s17 + $0x8] sm:$0xff] (!%p2027_p10), %v2030_v31  ;;  %v2032_v33 = vld [vmem:[%s3004_s11 + $0xe0] sm:$0xff] (!%p2027_p10)  ;;  %v2033_v34 = vld [vmem:[%s3004_s11 + $0xf0] sm:$0xff] (!%p2027_p10) }
  0x37   : > { %403 = vst [vmem:[%s3009_s17 + $0x18] sm:$0xff] %v2031_v32  ;;  %v2034_v35 = vld [vmem:[%s3004_s11 + $0xf8] sm:$0xff]  ;;  %405 = vst [vmem:[%s3009_s17 + $0x20] sm:$0xff] %v2032_v33  ;;  %v2035_v36 = vld [vmem:[%s3004_s11 + $0x108] sm:$0xff] }
  0x38   : > { %407 = vst [vmem:[%s3009_s17 + $0x30] sm:$0xff] %v2033_v34  ;;  %409 = vst [vmem:[%s3009_s17 + $0x38] sm:$0xff] %v2034_v35  ;;  %v2036_v37 = vld [vmem:[%s3004_s11 + $0x110] sm:$0xff]  ;;  %v2037_v38 = vld [vmem:[%s3004_s11 + $0x120] sm:$0xff] }
  0x39   : > { %411 = vst [vmem:[%s3009_s17 + $0x48] sm:$0xff] %v2035_v36  ;;  %413 = vst [vmem:[%s3009_s17 + $0x50] sm:$0xff] %v2036_v37  ;;  %v2038_v39 = vld [vmem:[%s3004_s11 + $0x128] sm:$0xff]  ;;  %v2039_v40 = vld [vmem:[%s3004_s11 + $0x138] sm:$0xff] }
  0x3a   : > { %415 = vst [vmem:[%s3009_s17 + $0x60] sm:$0xff] %v2037_v38  ;;  %v2040_v41 = vld [vmem:[%s3004_s11 + $0x140] sm:$0xff]  ;;  %417 = vst [vmem:[%s3009_s17 + $0x68] sm:$0xff] %v2038_v39  ;;  %v2041_v42 = vld [vmem:[%s3004_s11 + $0x150] sm:$0xff] }
  0x3b   : > { %419 = vst [vmem:[%s3009_s17 + $0x78] sm:$0xff] %v2039_v40  ;;  %421 = vst [vmem:[%s3009_s17 + $0x80] sm:$0xff] %v2040_v41  ;;  %v2042_v43 = vld [vmem:[%s3004_s11 + $0x158] sm:$0xff]  ;;  %v2043_v44 = vld [vmem:[%s3004_s11 + $0x168] sm:$0xff] }
  0x3c   : > { %423 = vst [vmem:[%s3009_s17 + $0x90] sm:$0xff] %v2041_v42  ;;  %425 = vst [vmem:[%s3009_s17 + $0x98] sm:$0xff] %v2042_v43  ;;  %v2044_v45 = vld [vmem:[%s3004_s11 + $0x170] sm:$0xff]  ;;  %v2045_v46 = vld [vmem:[%s3004_s11 + $0x180] sm:$0xff] }
  0x3d   : > { %427 = vst [vmem:[%s3009_s17 + $0xa8] sm:$0xff] %v2043_v44  ;;  %v2046_v47 = vld [vmem:[%s3004_s11 + $0x188] sm:$0xff]  ;;  %429 = vst [vmem:[%s3009_s17 + $0xb0] sm:$0xff] %v2044_v45  ;;  %v2047_v48 = vld [vmem:[%s3004_s11 + $0x198] sm:$0xff] }
  0x3e   : > { %431 = vst [vmem:[%s3009_s17 + $0xc0] sm:$0xff] %v2045_v46  ;;  %433 = vst [vmem:[%s3009_s17 + $0xc8] sm:$0xff] %v2046_v47  ;;  %v2048_v49 = vld [vmem:[%s3004_s11 + $0x1a0] sm:$0xff]  ;;  %v2049_v50 = vld [vmem:[%s3004_s11 + $0xd0] sm:$0x3] }
  0x3f   : > { %435 = vst [vmem:[%s3009_s17 + $0xd8] sm:$0xff] %v2047_v48  ;;  %437 = vst [vmem:[%s3009_s17 + $0xe0] sm:$0xff] %v2048_v49  ;;  %v2051_v51 = vld [vmem:[%s3004_s11 + $0xe8] sm:$0x3]  ;;  %v2053_v52 = vld [vmem:[%s3004_s11 + $0x100] sm:$0x3] }
  0x40   : > { %2050 = vst [vmem:[%s3009_s17 + $0x10] sm:$0x3] %v2049_v50  ;;  %v2055_v53 = vld [vmem:[%s3004_s11 + $0x118] sm:$0x3]  ;;  %2052 = vst [vmem:[%s3009_s17 + $0x28] sm:$0x3] %v2051_v51 }
  0x41   : > { %2054 = vst [vmem:[%s3009_s17 + $0x40] sm:$0x3] %v2053_v52  ;;  %2056 = vst [vmem:[%s3009_s17 + $0x58] sm:$0x3] %v2055_v53  ;;  %v2057_v54 = vld [vmem:[%s3004_s11 + $0x130] sm:$0x3] }
  0x42   : > { %v2059_v55 = vld [vmem:[%s3004_s11 + $0x148] sm:$0x3]  ;;  %v2061_v56 = vld [vmem:[%s3004_s11 + $0x160] sm:$0x3]  ;;  %2058 = vst [vmem:[%s3009_s17 + $0x70] sm:$0x3] %v2057_v54 }
  0x43   : > { %2060 = vst [vmem:[%s3009_s17 + $0x88] sm:$0x3] %v2059_v55  ;;  %2062 = vst [vmem:[%s3009_s17 + $0xa0] sm:$0x3] %v2061_v56  ;;  %v2063_v57 = vld [vmem:[%s3004_s11 + $0x178] sm:$0x3] }
  0x44   : > { %v2065_v58 = vld [vmem:[%s3004_s11 + $0x190] sm:$0x3]  ;;  %v2067_v59 = vld [vmem:[%s3004_s11 + $0x1a8] sm:$0x3]  ;;  %2064 = vst [vmem:[%s3009_s17 + $0xb8] sm:$0x3] %v2063_v57 }
  0x45   : > { %2066 = vst [vmem:[%s3009_s17 + $0xd0] sm:$0x3] %v2065_v58  ;;  %2068 = vst [vmem:[%s3009_s17 + $0xe8] sm:$0x3] %v2067_v59 }
  0x46   : > { %470 = vsyncadd %s342_s18, 2880 }
  0x47 PF: > { %s471_s12 = scalar_lea.sflag [#allocation4], %s3981_s10 }
  0x48   : > { %2824 = dma.done.wait %s471_s12, 2880 }
  0x49   : > { %2825 = vsyncadd %s471_s12, 4294964416  ;;  %v930_v60 = vld [vmem:[%s3962_s1 + $0x80] sm:$0xff]  ;;  %v931_v61 = vld [vmem:[%s3962_s1 + $0x88] sm:$0xff]  ;;  %s476_s27 = smul.u32 240, %s3981_s10  ;;  %vm1839_vm1 = vcmask 64512  }
  0x4a   : > { %v962_v62 = vld [vmem:[%s3962_s1 + $0x180] sm:$0xff]  ;;  %v2588_v63 = vpack.c.bf16 %v931_v61, %v930_v60  ;;  %v963_v0 = vld [vmem:[%s3962_s1 + $0x188] sm:$0xff]  ;;  %v932_v7 = vld [vmem:[%s3962_s1 + $0x90] sm:$0xff] }
  0x4b   : > { %v914_v1 = vld [vmem:[%s3962_s1] sm:$0xff]  ;;  %v915_v2 = vld [vmem:[%s3962_s1 + $0x8] sm:$0xff]  ;;  %v2620_v3 = vpack.c.bf16 %v963_v0, %v962_v62  ;;  %v933_v9 = vld [vmem:[%s3962_s1 + $0x98] sm:$0xff]  ;;  %s3237_s10 = scalar_lea.vmem [#allocation2], %s476_s27 }
  0x4c   : > { %v2590_v4 = vpack.c.bf16 %v915_v2, %v914_v1  ;;  %v946_v5 = vld [vmem:[%s3962_s1 + $0x100] sm:$0xff]  ;;  %v947_v6 = vld [vmem:[%s3962_s1 + $0x108] sm:$0xff]  ;;  %2589 = vmatprep.subr.bf16.mxu0 %v2588_v63  ;;  %v964_v10 = vld [vmem:[%s3962_s1 + $0x190] sm:$0xff]  ;;  %v2592_v12 = vpack.c.bf16 %v933_v9, %v932_v7 }
  0x4d   : > { %v2622_v8 = vpack.c.bf16 %v947_v6, %v946_v5  ;;  %v965_v11 = vld [vmem:[%s3962_s1 + $0x198] sm:$0xff]  ;;  %2621 = vmatprep.subr.bf16.mxu1 %v2620_v3  ;;  %v916_v14 = vld [vmem:[%s3962_s1 + $0x10] sm:$0xff]  ;;  %v934_v19 = vld [vmem:[%s3962_s1 + $0xa0] sm:$0xff] }
  0x4e   : > { %2591 = vmatpush3.bf16.msra.mxu0 %v2590_v4  ;;  %v2624_v13 = vpack.c.bf16 %v965_v11, %v964_v10  ;;  %v917_v15 = vld [vmem:[%s3962_s1 + $0x18] sm:$0xff]  ;;  %v948_v16 = vld [vmem:[%s3962_s1 + $0x110] sm:$0xff]  ;;  %v935_v20 = vld [vmem:[%s3962_s1 + $0xa8] sm:$0xff] }
  0x4f   : > { %2623 = vmatpush3.bf16.msra.mxu1 %v2622_v8  ;;  %v2594_v17 = vpack.c.bf16 %v917_v15, %v916_v14  ;;  %v949_v18 = vld [vmem:[%s3962_s1 + $0x118] sm:$0xff]  ;;  %2593 = vmatprep.subr.bf16.mxu0 %v2592_v12  ;;  %v2596_v22 = vpack.c.bf16 %v935_v20, %v934_v19  ;;  %v966_v23 = vld [vmem:[%s3962_s1 + $0x1a0] sm:$0xff]  ;;  %v967_v24 = vld [vmem:[%s3962_s1 + $0x1a8] sm:$0xff] }
  0x50   : > { %2625 = vmatprep.subr.bf16.mxu1 %v2624_v13  ;;  %v2626_v21 = vpack.c.bf16 %v949_v18, %v948_v16  ;;  %v918_v25 = vld [vmem:[%s3962_s1 + $0x20] sm:$0xff]  ;;  %v2628_v26 = vpack.c.bf16 %v967_v24, %v966_v23  ;;  %v919_v27 = vld [vmem:[%s3962_s1 + $0x28] sm:$0xff]  ;;  %v936_v31 = vld [vmem:[%s3962_s1 + $0xb0] sm:$0xff] }
  0x51   : > { %v950_v28 = vld [vmem:[%s3962_s1 + $0x120] sm:$0xff]  ;;  %v951_v29 = vld [vmem:[%s3962_s1 + $0x128] sm:$0xff]  ;;  %v2598_v30 = vpack.c.bf16 %v919_v27, %v918_v25  ;;  %v937_v32 = vld [vmem:[%s3962_s1 + $0xb8] sm:$0xff] }
  0x52   : > { %2595 = vmatpush3.bf16.msra.mxu0 %v2594_v17  ;;  %v968_v33 = vld [vmem:[%s3962_s1 + $0x1b0] sm:$0xff]  ;;  %v2630_v34 = vpack.c.bf16 %v951_v29, %v950_v28  ;;  %v2600_v35 = vpack.c.bf16 %v937_v32, %v936_v31  ;;  %v969_v36 = vld [vmem:[%s3962_s1 + $0x1b8] sm:$0xff]  ;;  %v938_v42 = vld [vmem:[%s3962_s1 + $0xc0] sm:$0xff] }
  0x53   : > { %2627 = vmatpush3.bf16.msra.mxu1 %v2626_v21  ;;  %2597 = vmatprep.subr.bf16.mxu0 %v2596_v22  ;;  %v920_v37 = vld [vmem:[%s3962_s1 + $0x30] sm:$0xff]  ;;  %v921_v38 = vld [vmem:[%s3962_s1 + $0x38] sm:$0xff]  ;;  %v2632_v39 = vpack.c.bf16 %v969_v36, %v968_v33  ;;  %v939_v43 = vld [vmem:[%s3962_s1 + $0xc8] sm:$0xff] }
  0x54   : > { %2629 = vmatprep.subr.bf16.mxu1 %v2628_v26  ;;  %v952_v40 = vld [vmem:[%s3962_s1 + $0x130] sm:$0xff]  ;;  %v953_v41 = vld [vmem:[%s3962_s1 + $0x138] sm:$0xff]  ;;  %v970_v44 = vld [vmem:[%s3962_s1 + $0x1c0] sm:$0xff]  ;;  %v2602_v46 = vpack.c.bf16 %v921_v38, %v920_v37  ;;  %v2604_v48 = vpack.c.bf16 %v939_v43, %v938_v42 }
  0x55   : > { %v971_v45 = vld [vmem:[%s3962_s1 + $0x1c8] sm:$0xff]  ;;  %v2634_v47 = vpack.c.bf16 %v953_v41, %v952_v40  ;;  %v922_v49 = vld [vmem:[%s3962_s1 + $0x40] sm:$0xff]  ;;  %v940_v54 = vld [vmem:[%s3962_s1 + $0xd0] sm:$0xff] }
  0x56   : > { %2599 = vmatpush3.bf16.msra.mxu0 %v2598_v30  ;;  %v923_v50 = vld [vmem:[%s3962_s1 + $0x48] sm:$0xff]  ;;  %v954_v51 = vld [vmem:[%s3962_s1 + $0x140] sm:$0xff]  ;;  %v2636_v52 = vpack.c.bf16 %v971_v45, %v970_v44  ;;  %v941_v55 = vld [vmem:[%s3962_s1 + $0xd8] sm:$0xff] }
  0x57   : > { %2631 = vmatpush3.bf16.msra.mxu1 %v2630_v34  ;;  %2601 = vmatprep.subr.bf16.mxu0 %v2600_v35  ;;  %v955_v53 = vld [vmem:[%s3962_s1 + $0x148] sm:$0xff]  ;;  %v972_v56 = vld [vmem:[%s3962_s1 + $0x1d0] sm:$0xff]  ;;  %v973_v57 = vld [vmem:[%s3962_s1 + $0x1d8] sm:$0xff]  ;;  %v2606_v58 = vpack.c.bf16 %v923_v50, %v922_v49  ;;  %v2608_v60 = vpack.c.bf16 %v941_v55, %v940_v54 }
  0x58   : > { %2633 = vmatprep.subr.bf16.mxu1 %v2632_v39  ;;  %v2638_v59 = vpack.c.bf16 %v955_v53, %v954_v51  ;;  %v924_v61 = vld [vmem:[%s3962_s1 + $0x50] sm:$0xff]  ;;  %v925_v62 = vld [vmem:[%s3962_s1 + $0x58] sm:$0xff]  ;;  %v2640_v0 = vpack.c.bf16 %v973_v57, %v972_v56  ;;  %v942_v2 = vld [vmem:[%s3962_s1 + $0xe0] sm:$0xff] }
  0x59   : > { %v956_v63 = vld [vmem:[%s3962_s1 + $0x150] sm:$0xff]  ;;  %v957_v1 = vld [vmem:[%s3962_s1 + $0x158] sm:$0xff]  ;;  %v943_v3 = vld [vmem:[%s3962_s1 + $0xe8] sm:$0xff]  ;;  %v2610_v6 = vpack.c.bf16 %v925_v62, %v924_v61 }
  0x5a   : > { %2603 = vmatpush3.bf16.msra.mxu0 %v2602_v46  ;;  %v974_v4 = vld [vmem:[%s3962_s1 + $0x1e0] sm:$0xff]  ;;  %v975_v5 = vld [vmem:[%s3962_s1 + $0x1e8] sm:$0xff]  ;;  %v2642_v9 = vpack.c.bf16 %v957_v1, %v956_v63  ;;  %v2612_v10 = vpack.c.bf16 %v943_v3, %v942_v2  ;;  %v944_v16 = vld [vmem:[%s3962_s1 + $0xf0] sm:$0xff] }
  0x5b   : > { %2635 = vmatpush3.bf16.msra.mxu1 %v2634_v47  ;;  %2605 = vmatprep.subr.bf16.mxu0 %v2604_v48  ;;  %v926_v7 = vld [vmem:[%s3962_s1 + $0x60] sm:$0xff]  ;;  %v927_v8 = vld [vmem:[%s3962_s1 + $0x68] sm:$0xff]  ;;  %v2644_v14 = vpack.c.bf16 %v975_v5, %v974_v4  ;;  %v945_v17 = vld [vmem:[%s3962_s1 + $0xf8] sm:$0xff] }
  0x5c   : > { %2637 = vmatprep.subr.bf16.mxu1 %v2636_v52  ;;  %v958_v11 = vld [vmem:[%s3962_s1 + $0x160] sm:$0xff]  ;;  %v3241_v13 = vld [vmem:[%s3237_s10 + $0x18] sm:$0xff]  ;;  %v976_v18 = vld [vmem:[%s3962_s1 + $0x1f0] sm:$0xff]  ;;  %v2614_v20 = vpack.c.bf16 %v927_v8, %v926_v7  ;;  %v2616_v22 = vpack.c.bf16 %v945_v17, %v944_v16 }
  0x5d   : > { %v510_v12 = vld [vmem:[%s3237_s10 + $0x1] sm:$0xff]  ;;  %1274 = vmatprep.mubr.f32.mxu1 %v3241_v13  ;;  %v511_v48 = vld [vmem:[%s3237_s10 + $0x9] sm:$0xff]  ;;  %v3340_v62 = vld [vmem:[%s3237_s10 + $0x19] sm:$0xff] }
  0x5e   : > { %2607 = vmatpush3.bf16.msra.mxu0 %v2606_v58  ;;  %v959_v15 = vld [vmem:[%s3962_s1 + $0x168] sm:$0xff]  ;;  %1129 = vmatprep.mubr.f32.mxu0 %v510_v12  ;;  %v977_v19 = vld [vmem:[%s3962_s1 + $0x1f8] sm:$0xff]  ;;  %v928_v23 = vld [vmem:[%s3962_s1 + $0x70] sm:$0xff] }
  0x5f   : > { %2639 = vmatpush3.bf16.msra.mxu1 %v2638_v59  ;;  %2609 = vmatprep.subr.bf16.mxu0 %v2608_v60  ;;  %v2646_v21 = vpack.c.bf16 %v959_v15, %v958_v11  ;;  %v929_v24 = vld [vmem:[%s3962_s1 + $0x78] sm:$0xff]  ;;  %v960_v25 = vld [vmem:[%s3962_s1 + $0x170] sm:$0xff]  ;;  %v2648_v26 = vpack.c.bf16 %v977_v19, %v976_v18  ;;  %v994_v28 = vld [vmem:[%s3962_s1 + $0x280] sm:$0xff] }
  0x60   : > { %2641 = vmatprep.subr.bf16.mxu1 %v2640_v0  ;;  %v961_v27 = vld [vmem:[%s3962_s1 + $0x178] sm:$0xff]  ;;  %v995_v29 = vld [vmem:[%s3962_s1 + $0x288] sm:$0xff]  ;;  %v1026_v30 = vld [vmem:[%s3962_s1 + $0x380] sm:$0xff]  ;;  %v2618_v32 = vpack.c.bf16 %v929_v24, %v928_v23 }
  0x61   : > { %v1027_v31 = vld [vmem:[%s3962_s1 + $0x388] sm:$0xff]  ;;  %v2650_v33 = vpack.c.bf16 %v961_v27, %v960_v25  ;;  %v2652_v34 = vpack.c.bf16 %v995_v29, %v994_v28  ;;  %v978_v35 = vld [vmem:[%s3962_s1 + $0x200] sm:$0xff]  ;;  %v996_v40 = vld [vmem:[%s3962_s1 + $0x290] sm:$0xff] }
  0x62   : > { %2611 = vmatpush3.bf16.msra.mxu0 %v2610_v6  ;;  %v979_v36 = vld [vmem:[%s3962_s1 + $0x208] sm:$0xff]  ;;  %v2684_v37 = vpack.c.bf16 %v1027_v31, %v1026_v30  ;;  %v1010_v38 = vld [vmem:[%s3962_s1 + $0x300] sm:$0xff]  ;;  %v997_v41 = vld [vmem:[%s3962_s1 + $0x298] sm:$0xff] }
  0x63   : > { %2643 = vmatpush3.bf16.msra.mxu1 %v2642_v9  ;;  %2613 = vmatprep.subr.bf16.mxu0 %v2612_v10  ;;  %v1011_v39 = vld [vmem:[%s3962_s1 + $0x308] sm:$0xff]  ;;  %v478_v42 = vld [vmem:[%s3237_s10] sm:$0xff]  ;;  %v2654_v43 = vpack.c.bf16 %v979_v36, %v978_v35  ;;  %v1029_v45 = vld [vmem:[%s3962_s1 + $0x398] sm:$0xff]  ;;  %v2656_v50 = vpack.c.bf16 %v997_v41, %v996_v40 }
  0x64   : > { %2645 = vmatprep.subr.bf16.mxu1 %v2644_v14  ;;  %v1028_v44 = vld [vmem:[%s3962_s1 + $0x390] sm:$0xff]  ;;  %v2686_v47 = vpack.c.bf16 %v1011_v39, %v1010_v38  ;;  %v981_v52 = vld [vmem:[%s3962_s1 + $0x218] sm:$0xff]  ;;  %v998_v56 = vld [vmem:[%s3962_s1 + $0x2a0] sm:$0xff] }
  0x65   : > { %v542_v46 = vld [vmem:[%s3237_s10 + $0x2] sm:$0xff]  ;;  %v2688_v54 = vpack.c.bf16 %v1029_v45, %v1028_v44  ;;  %v543_v61 = vld [vmem:[%s3237_s10 + $0xa] sm:$0xff]  ;;  %v3373_v12 = vld [vmem:[%s3237_s10 + $0x1a] sm:$0xff] }
  0x66   : > { %2615 = vmatpush3.bf16.msra.mxu0 %v2614_v20  ;;  %v3311_v49 = vld [vmem:[%s3237_s10 + $0x20] sm:$0xff]  ;;  %v1013_v55 = vld [vmem:[%s3962_s1 + $0x318] sm:$0xff]  ;;  %v999_v57 = vld [vmem:[%s3962_s1 + $0x2a8] sm:$0xff] }
  0x67   : > { %2647 = vmatpush3.bf16.msra.mxu1 %v2646_v21  ;;  %2617 = vmatprep.subr.bf16.mxu0 %v2616_v22  ;;  %v980_v51 = vld [vmem:[%s3962_s1 + $0x210] sm:$0xff]  ;;  %v479_v58 = vld [vmem:[%s3237_s10 + $0x8] sm:$0xff]  ;;  %v1030_v59 = vld [vmem:[%s3962_s1 + $0x3a0] sm:$0xff]  ;;  %v2660_v2 = vpack.c.bf16 %v999_v57, %v998_v56 }
  0x68   : > { %2649 = vmatprep.subr.bf16.mxu1 %v2648_v26  ;;  %v1012_v53 = vld [vmem:[%s3962_s1 + $0x310] sm:$0xff]  ;;  %v1031_v60 = vld [vmem:[%s3962_s1 + $0x3a8] sm:$0xff]  ;;  %v2658_v0 = vpack.c.bf16 %v981_v52, %v980_v51  ;;  %v982_v3 = vld [vmem:[%s3962_s1 + $0x220] sm:$0xff] }
  0x69   : > { %v3343_v63 = vld [vmem:[%s3237_s10 + $0x30] sm:$0xff]  ;;  %v2690_v1 = vpack.c.bf16 %v1013_v55, %v1012_v53  ;;  %v983_v4 = vld [vmem:[%s3962_s1 + $0x228] sm:$0xff]  ;;  %v2692_v6 = vpack.c.bf16 %v1031_v60, %v1030_v59  ;;  %v1001_v9 = vld [vmem:[%s3962_s1 + $0x2b8] sm:$0xff] }
  0x6a   : > { %2619 = vmatpush3.bf16.msra.mxu0 %v2618_v32  ;;  %v1014_v5 = vld [vmem:[%s3962_s1 + $0x320] sm:$0xff]  ;;  %v1015_v7 = vld [vmem:[%s3962_s1 + $0x328] sm:$0xff]  ;;  %v1000_v8 = vld [vmem:[%s3962_s1 + $0x2b0] sm:$0xff]  ;;  %v2662_v16 = vpack.c.bf16 %v983_v4, %v982_v3 }
  0x6b   : > { %2651 = vmatpush3.bf16.msra.mxu1 %v2650_v33  ;;  %2653 = vmatprep.subr.bf16.mxu0 %v2652_v34  ;;  %v1032_v10 = vld [vmem:[%s3962_s1 + $0x3b0] sm:$0xff]  ;;  %v1033_v11 = vld [vmem:[%s3962_s1 + $0x3b8] sm:$0xff]  ;;  %v2694_v17 = vpack.c.bf16 %v1015_v7, %v1014_v5  ;;  %v2664_v18 = vpack.c.bf16 %v1001_v9, %v1000_v8  ;;  %v1002_v24 = vld [vmem:[%s3962_s1 + $0x2c0] sm:$0xff] }
  0x6c   : > { %2685 = vmatprep.subr.bf16.mxu1 %v2684_v37  ;;  %v3376_v14 = vld [vmem:[%s3237_s10 + $0x21] sm:$0xff]  ;;  %v3379_v15 = vld [vmem:[%s3237_s10 + $0x38] sm:$0xff]  ;;  %v2696_v22 = vpack.c.bf16 %v1033_v11, %v1032_v10  ;;  %v3453_v44 = vld [vmem:[%s3237_s10 + $0x50] sm:$0xff] }
  0x6d   : > { %1130 = vmatmul.mubr.f32.vlgmr.msra.gmra.mrb[0].mxu0 %v478_v42  ;;  %v984_v19 = vld [vmem:[%s3962_s1 + $0x230] sm:$0xff]  ;;  %v985_v20 = vld [vmem:[%s3962_s1 + $0x238] sm:$0xff]  ;;  %v1003_v25 = vld [vmem:[%s3962_s1 + $0x2c8] sm:$0xff] }
  0x6e   : > { %1275 = vmatmul.mubr.f32.vlgmr.msra.gmra.mrb[0].mxu1 %v542_v46  ;;  %2655 = vmatpush3.bf16.msra.mxu0 %v2654_v43  ;;  %v1016_v21 = vld [vmem:[%s3962_s1 + $0x330] sm:$0xff]  ;;  %v1017_v23 = vld [vmem:[%s3962_s1 + $0x338] sm:$0xff]  ;;  %v1035_v26 = vld [vmem:[%s3962_s1 + $0x3c8] sm:$0xff]  ;;  %v2666_v30 = vpack.c.bf16 %v985_v20, %v984_v19  ;;  %v2668_v32 = vpack.c.bf16 %v1003_v25, %v1002_v24 }
  0x6f   : > { %2687 = vmatpush3.bf16.msra.mxu1 %v2686_v47  ;;  %1134 = vmatprep.mubr.f32.mxu0 %v511_v48  ;;  %v3410_v27 = vld [vmem:[%s3237_s10 + $0x22] sm:$0xff]  ;;  %v3413_v28 = vld [vmem:[%s3237_s10 + $0x31] sm:$0xff]  ;;  %v2698_v31 = vpack.c.bf16 %v1017_v23, %v1016_v21  ;;  %v3450_v43 = vld [vmem:[%s3237_s10 + $0x39] sm:$0xff] }
  0x70   : > { %1279 = vmatprep.mubr.f32.mxu1 %v3311_v49  ;;  %2657 = vmatprep.subr.bf16.mxu0 %v2656_v50  ;;  %v3416_v29 = vld [vmem:[%s3237_s10 + $0x48] sm:$0xff]  ;;  %v986_v33 = vld [vmem:[%s3962_s1 + $0x240] sm:$0xff]  ;;  %v1004_v38 = vld [vmem:[%s3962_s1 + $0x2d0] sm:$0xff] }
  0x71   : > { %1135 = vmatmul.mubr.f32.gmra.mrb[2].mxu0 %v479_v58  ;;  %2689 = vmatprep.subr.bf16.mxu1 %v2688_v54  ;;  %v987_v34 = vld [vmem:[%s3962_s1 + $0x248] sm:$0xff]  ;;  %v1018_v35 = vld [vmem:[%s3962_s1 + $0x340] sm:$0xff]  ;;  %v1005_v39 = vld [vmem:[%s3962_s1 + $0x2d8] sm:$0xff] }
  0x72   : > { %1280 = vmatmul.mubr.f32.gmra.mrb[2].mxu1 %v543_v61  ;;  %1139 = vmatprep.mubr.f32.mxu0 %v3340_v62  ;;  %v1019_v37 = vld [vmem:[%s3962_s1 + $0x348] sm:$0xff]  ;;  %v1036_v40 = vld [vmem:[%s3962_s1 + $0x3d0] sm:$0xff]  ;;  %v1037_v41 = vld [vmem:[%s3962_s1 + $0x3d8] sm:$0xff]  ;;  %v2670_v45 = vpack.c.bf16 %v987_v34, %v986_v33  ;;  %v2672_v47 = vpack.c.bf16 %v1005_v39, %v1004_v38 }
  0x73   : > { %1284 = vmatprep.mubr.f32.mxu1 %v3343_v63  ;;  %2659 = vmatpush3.bf16.msra.mxu0 %v2658_v0  ;;  %v3447_v42 = vld [vmem:[%s3237_s10 + $0x32] sm:$0xff]  ;;  %v2702_v46 = vpack.c.bf16 %v1019_v37, %v1018_v35  ;;  %v2704_v51 = vpack.c.bf16 %v1037_v41, %v1036_v40  ;;  %v3484_v57 = vld [vmem:[%s3237_s10 + $0x3a] sm:$0xff]  ;;  %v3487_v58 = vld [vmem:[%s3237_s10 + $0x49] sm:$0xff] }
  0x74   : > { %2691 = vmatpush3.bf16.msra.mxu1 %v2690_v1  ;;  %2661 = vmatprep.subr.bf16.mxu0 %v2660_v2  ;;  %v988_v48 = vld [vmem:[%s3962_s1 + $0x250] sm:$0xff]  ;;  %v1021_v52 = vld [vmem:[%s3962_s1 + $0x358] sm:$0xff]  ;;  %v1006_v53 = vld [vmem:[%s3962_s1 + $0x2e0] sm:$0xff] }
  0x75   : > { %1140 = vmatmul.mubr.f32.gmra.mrb[4].mxu0 %v3241_v13  ;;  %2693 = vmatprep.subr.bf16.mxu1 %v2692_v6  ;;  %v1034_v13 = vld [vmem:[%s3962_s1 + $0x3c0] sm:$0xff]  ;;  %v1020_v50 = vld [vmem:[%s3962_s1 + $0x350] sm:$0xff]  ;;  %v1007_v54 = vld [vmem:[%s3962_s1 + $0x2e8] sm:$0xff] }
  0x76   : > { %1285 = vmatmul.mubr.f32.gmra.mrb[4].mxu1 %v3373_v12  ;;  %1144 = vmatprep.mubr.f32.mxu0 %v3376_v14  ;;  %v2700_v36 = vpack.c.bf16 %v1035_v26, %v1034_v13  ;;  %v1038_v55 = vld [vmem:[%s3962_s1 + $0x3e0] sm:$0xff]  ;;  %v1039_v56 = vld [vmem:[%s3962_s1 + $0x3e8] sm:$0xff]  ;;  %v2706_v61 = vpack.c.bf16 %v1021_v52, %v1020_v50  ;;  %v2676_v0 = vpack.c.bf16 %v1007_v54, %v1006_v53  ;;  %v1008_v6 = vld [vmem:[%s3962_s1 + $0x2f0] sm:$0xff] }
  0x77   : > { %1289 = vmatprep.mubr.f32.mxu1 %v3379_v15  ;;  %2663 = vmatpush3.bf16.msra.mxu0 %v2662_v16  ;;  %v3490_v60 = vld [vmem:[%s3237_s10 + $0x60] sm:$0xff]  ;;  %v991_v2 = vld [vmem:[%s3962_s1 + $0x268] sm:$0xff]  ;;  %v2708_v3 = vpack.c.bf16 %v1039_v56, %v1038_v55  ;;  %v1009_v7 = vld [vmem:[%s3962_s1 + $0x2f8] sm:$0xff] }
  0x78   : > { %2695 = vmatpush3.bf16.msra.mxu1 %v2694_v17  ;;  %2665 = vmatprep.subr.bf16.mxu0 %v2664_v18  ;;  %v990_v1 = vld [vmem:[%s3962_s1 + $0x260] sm:$0xff]  ;;  %v1023_v5 = vld [vmem:[%s3962_s1 + $0x368] sm:$0xff]  ;;  %v1040_v8 = vld [vmem:[%s3962_s1 + $0x3f0] sm:$0xff]  ;;  %v2680_v19 = vpack.c.bf16 %v1009_v7, %v1008_v6 }
  0x79   : > { %1145 = vmatmul.mubr.f32.gmra.mrb[6].mxu0 %v3311_v49  ;;  %2697 = vmatprep.subr.bf16.mxu1 %v2696_v22  ;;  %v989_v49 = vld [vmem:[%s3962_s1 + $0x258] sm:$0xff]  ;;  %v1022_v4 = vld [vmem:[%s3962_s1 + $0x360] sm:$0xff]  ;;  %v2678_v17 = vpack.c.bf16 %v991_v2, %v990_v1  ;;  %v992_v20 = vld [vmem:[%s3962_s1 + $0x270] sm:$0xff] }
  0x7a   : > { %1290 = vmatmul.mubr.f32.gmra.mrb[6].mxu1 %v3410_v27  ;;  %1149 = vmatprep.mubr.f32.mxu0 %v3413_v28  ;;  %v2674_v59 = vpack.c.bf16 %v989_v49, %v988_v48  ;;  %v1041_v9 = vld [vmem:[%s3962_s1 + $0x3f8] sm:$0xff]  ;;  %v2710_v18 = vpack.c.bf16 %v1023_v5, %v1022_v4  ;;  %v1024_v22 = vld [vmem:[%s3962_s1 + $0x370] sm:$0xff]  ;;  %v1042_v25 = vld [vmem:[%s3962_s1 + $0x400] sm:$0xff] }
  0x7b   : > { %1294 = vmatprep.mubr.f32.mxu1 %v3416_v29  ;;  %2667 = vmatpush3.bf16.msra.mxu0 %v2666_v30  ;;  %v3521_v10 = vld [vmem:[%s3237_s10 + $0x4a] sm:$0xff]  ;;  %v2712_v23 = vpack.c.bf16 %v1041_v9, %v1040_v8  ;;  %v3552_v26 = vld [vmem:[%s3237_s10 + $0x52] sm:$0xff]  ;;  %v3555_v30 = vld [vmem:[%s3237_s10 + $0x61] sm:$0xff] }
  0x7c   : > { %2699 = vmatpush3.bf16.msra.mxu1 %v2698_v31  ;;  %2669 = vmatprep.subr.bf16.mxu0 %v2668_v32  ;;  %v3524_v11 = vld [vmem:[%s3237_s10 + $0x51] sm:$0xff]  ;;  %v3527_v16 = vld [vmem:[%s3237_s10 + $0x68] sm:$0xff]  ;;  %v3573_v37 = vld [vmem:[%s3237_s10 + $0x80] sm:$0xff] }
  0x7d   : > { %1150 = vmatmul.mubr.f32.gmra.mrb[8].mxu0 %v3343_v63  ;;  %2701 = vmatprep.subr.bf16.mxu1 %v2700_v36  ;;  %v993_v21 = vld [vmem:[%s3962_s1 + $0x278] sm:$0xff]  ;;  %v1043_v13 = vld [vmem:[%s3962_s1 + $0x408] sm:$0xff]  ;;  %v3588_v40 = vld [vmem:[%s3237_s10 + $0x90] sm:$0xff] }
  0x7e   : > { %1295 = vmatmul.mubr.f32.gmra.mrb[8].mxu1 %v3447_v42  ;;  %1154 = vmatprep.mubr.f32.mxu0 %v3450_v43  ;;  %v1025_v24 = vld [vmem:[%s3962_s1 + $0x378] sm:$0xff]  ;;  %v2682_v31 = vpack.c.bf16 %v993_v21, %v992_v20  ;;  %v3560_v34 = vpack.c.bf16 %v1043_v13, %v1042_v25  ;;  %v3627_v52 = vld [vmem:[%s3237_s10 + $0xb0] sm:$0xff]  ;;  %v3640_v55 = vld [vmem:[%s3237_s10 + $0xc0] sm:$0xff] }
  0x7f   : > { %1299 = vmatprep.mubr.f32.mxu1 %v3453_v44  ;;  %2671 = vmatpush3.bf16.msra.mxu0 %v2670_v45  ;;  %v3558_v32 = vld [vmem:[%s3237_s10 + $0x78] sm:$0xff]  ;;  %v2714_v33 = vpack.c.bf16 %v1025_v24, %v1024_v22  ;;  %v3567_v35 = vld [vmem:[%s3237_s10 + $0x62] sm:$0xff]  ;;  %v3582_v38 = vld [vmem:[%s3237_s10 + $0x6a] sm:$0xff] }
  0x80   : > { %2703 = vmatpush3.bf16.msra.mxu1 %v2702_v46  ;;  %2673 = vmatprep.subr.bf16.mxu0 %v2672_v47  ;;  %v3570_v36 = vld [vmem:[%s3237_s10 + $0x69] sm:$0xff]  ;;  %v3585_v39 = vld [vmem:[%s3237_s10 + $0x79] sm:$0xff]  ;;  %v3598_v45 = vld [vmem:[%s3237_s10 + $0x81] sm:$0xff] }
  0x81   : > { %1155 = vmatmul.mubr.f32.gmra.mrb[10].mxu0 %v3379_v15  ;;  %2705 = vmatprep.subr.bf16.mxu1 %v2704_v51  ;;  %v3595_v41 = vld [vmem:[%s3237_s10 + $0x7a] sm:$0xff]  ;;  %v3608_v47 = vld [vmem:[%s3237_s10 + $0x82] sm:$0xff]  ;;  %v3611_v48 = vld [vmem:[%s3237_s10 + $0x91] sm:$0xff] }
  0x82   : > { %1300 = vmatmul.mubr.f32.gmra.mrb[10].mxu1 %v3484_v57  ;;  %1159 = vmatprep.mubr.f32.mxu0 %v3487_v58  ;;  %v3601_v46 = vld [vmem:[%s3237_s10 + $0x98] sm:$0xff]  ;;  %v3614_v49 = vld [vmem:[%s3237_s10 + $0xa8] sm:$0xff]  ;;  %v1044_v1 = vld [vmem:[%s3962_s1 + $0x410] sm:$0xff] }
  0x83   : > { %1304 = vmatprep.mubr.f32.mxu1 %v3490_v60  ;;  %2675 = vmatpush3.bf16.msra.mxu0 %v2674_v59  ;;  %v3621_v50 = vld [vmem:[%s3237_s10 + $0x92] sm:$0xff]  ;;  %v3634_v53 = vld [vmem:[%s3237_s10 + $0x9a] sm:$0xff]  ;;  %v3637_v54 = vld [vmem:[%s3237_s10 + $0xa9] sm:$0xff] }
  0x84   : > { %2707 = vmatpush3.bf16.msra.mxu1 %v2706_v61  ;;  %2677 = vmatprep.subr.bf16.mxu0 %v2676_v0  ;;  %v3624_v51 = vld [vmem:[%s3237_s10 + $0x99] sm:$0xff]  ;;  %v3647_v56 = vld [vmem:[%s3237_s10 + $0xaa] sm:$0xff]  ;;  %v2158_v21 = vld [vmem:[%s3237_s10 + $0xe1] sm:$0xff] }
  0x85   : > { %1160 = vmatmul.mubr.f32.gmra.mrb[12].mxu0 %v3416_v29  ;;  %2709 = vmatprep.subr.bf16.mxu1 %v2708_v3  ;;  %v3650_v59 = vld [vmem:[%s3237_s10 + $0xb1] sm:$0xff]  ;;  %v3653_v61 = vld [vmem:[%s3237_s10 + $0xc8] sm:$0xff]  ;;  %v2142_v22 = vld [vmem:[%s3237_s10 + $0xe0] sm:$0xff] }
  0x86   : > { %1305 = vmatmul.mubr.f32.gmra.mrb[12].mxu1 %v3521_v10  ;;  %1164 = vmatprep.mubr.f32.mxu0 %v3524_v11  ;;  %v3660_v0 = vld [vmem:[%s3237_s10 + $0xb2] sm:$0xff]  ;;  %v2126_v20 = vld [vmem:[%s3237_s10 + $0xca] sm:$0xff] }
  0x87   : > { %1309 = vmatprep.mubr.f32.mxu1 %v3527_v16  ;;  %2679 = vmatpush3.bf16.msra.mxu0 %v2678_v17  ;;  %v1045_v2 = vld [vmem:[%s3962_s1 + $0x418] sm:$0xff]  ;;  %v1046_v4 = vld [vmem:[%s3962_s1 + $0x420] sm:$0xff]  ;;  %v1047_v5 = vld [vmem:[%s3962_s1 + $0x428] sm:$0xff] }
  0x88   : > { %2711 = vmatpush3.bf16.msra.mxu1 %v2710_v18  ;;  %2681 = vmatprep.subr.bf16.mxu0 %v2680_v19  ;;  %v2720_v3 = vpack.c.bf16 %v1045_v2, %v1044_v1  ;;  %v1051_v6 = vld [vmem:[%s3962_s1 + $0x448] sm:$0xff]  ;;  %v1053_v7 = vld [vmem:[%s3962_s1 + $0x458] sm:$0xff]  ;;  %v3787_v24 = vld [vmem:[%s3963_s2] ss:$0 sm:$0xff] }
  0x89   : > { %1165 = vmatmul.mubr.f32.gmra.mrb[14].mxu0 %v3453_v44  ;;  %2713 = vmatprep.subr.bf16.mxu1 %v2712_v23  ;;  %v1055_v8 = vld [vmem:[%s3962_s1 + $0x468] sm:$0xff]  ;;  %v1057_v9 = vld [vmem:[%s3962_s1 + $0x478] sm:$0xff] }
  0x8a   : > { %1310 = vmatmul.mubr.f32.gmra.mrb[14].mxu1 %v3552_v26  ;;  %1169 = vmatprep.mubr.f32.mxu0 %v3555_v30  ;;  %v2125_v17 = vld [vmem:[%s3237_s10 + $0xc2] sm:$0xff]  ;;  %v2157_v18 = vld [vmem:[%s3237_s10 + $0xd9] sm:$0xff] }
  0x8b   : > { %1314 = vmatprep.mubr.f32.mxu1 %v3558_v32  ;;  %2683 = vmatpush3.bf16.msra.mxu0 %v2682_v31  ;;  %v2141_v19 = vld [vmem:[%s3237_s10 + $0xd8] sm:$0xff] }
  0x8c   : > { %2715 = vmatpush3.bf16.msra.mxu1 %v2714_v33  ;;  %2717 = vmatprep.subr.bf16.mxu0 %v3560_v34  ;;  %v2173_v23 = vld [vmem:[%s3237_s10 + $0xda] sm:$0xff] }
  0x8d   : > { %1170 = vmatmul.mubr.f32.gmra.mrb[16].mxu0 %v3490_v60  ;;  %2748 = vmatprep.subr.bf16.mxu1 %v3560_v34 }
  0x8e   : > { %1315 = vmatmul.mubr.f32.gmra.mrb[16].mxu1 %v3567_v35  ;;  %1174 = vmatprep.mubr.f32.mxu0 %v3570_v36 }
  0x8f   : > { %1319 = vmatprep.mubr.f32.mxu1 %v3573_v37 }
  0x91   : > { %1175 = vmatmul.mubr.f32.gmra.mrb[18].mxu0 %v3527_v16 }
  0x92   : > { %1320 = vmatmul.mubr.f32.gmra.mrb[18].mxu1 %v3582_v38  ;;  %1179 = vmatprep.mubr.f32.mxu0 %v3585_v39 }
  0x93   : > { %1324 = vmatprep.mubr.f32.mxu1 %v3588_v40 }
  0x95   : > { %1180 = vmatmul.mubr.f32.gmra.mrb[20].mxu0 %v3558_v32 }
  0x96   : > { %1325 = vmatmul.mubr.f32.gmra.mrb[20].mxu1 %v3595_v41  ;;  %1184 = vmatprep.mubr.f32.mxu0 %v3598_v45 }
  0x97   : > { %1329 = vmatprep.mubr.f32.mxu1 %v3601_v46 }
  0x99   : > { %1185 = vmatmul.mubr.f32.gmra.mrb[22].mxu0 %v3573_v37 }
  0x9a   : > { %1330 = vmatmul.mubr.f32.gmra.mrb[22].mxu1 %v3608_v47  ;;  %1189 = vmatprep.mubr.f32.mxu0 %v3611_v48 }
  0x9b   : > { %1334 = vmatprep.mubr.f32.mxu1 %v3614_v49 }
  0x9d   : > { %1190 = vmatmul.mubr.f32.gmra.mrb[24].mxu0 %v3588_v40 }
  0x9e   : > { %1335 = vmatmul.mubr.f32.gmra.mrb[24].mxu1 %v3621_v50  ;;  %1194 = vmatprep.mubr.f32.mxu0 %v3624_v51 }
  0x9f   : > { %1339 = vmatprep.mubr.f32.mxu1 %v3627_v52 }
  0xa1   : > { %1195 = vmatmul.mubr.f32.gmra.mrb[26].mxu0 %v3601_v46 }
  0xa2   : > { %1340 = vmatmul.mubr.f32.gmra.mrb[26].mxu1 %v3634_v53  ;;  %1199 = vmatprep.mubr.f32.mxu0 %v3637_v54 }
  0xa3   : > { %1344 = vmatprep.mubr.f32.mxu1 %v3640_v55 }
  0xa5   : > { %1200 = vmatmul.mubr.f32.gmra.mrb[28].mxu0 %v3614_v49 }
  0xa6   : > { %1345 = vmatmul.mubr.f32.gmra.mrb[28].mxu1 %v3647_v56  ;;  %1204 = vmatprep.mubr.f32.mxu0 %v3650_v59 }
  0xa7   : > { %1349 = vmatprep.mubr.f32.mxu1 %v3653_v61 }
  0xa9   : > { %1205 = vmatmul.mubr.f32.gmra.mrb[30].mxu0 %v3627_v52 }
  0xaa   : > { %1350 = vmatmul.mubr.f32.gmra.mrb[30].mxu1 %v3660_v0  ;;  %1419 = vmatprep.mubr.f32.mxu0 %v3373_v12  ;;  %v1048_v12 = vld [vmem:[%s3962_s1 + $0x430] sm:$0xff] }
  0xab   : > { %1564 = vmatprep.mubr.f32.mxu1 %v3413_v28 }
  0xad   : > { %1420 = vmatmul.mubr.f32.vlgmr.msra.gmra.mrb[32].mxu0 %v3340_v62  ;;  %v2724_v62 = vpack.c.bf16 %v1047_v5, %v1046_v4 }
  0xae   : > { %1565 = vmatmul.mubr.f32.vlgmr.msra.gmra.mrb[32].mxu1 %v3343_v63  ;;  %2719 = vmatpush3.bf16.msra.mxu0 %v3560_v34  ;;  %v1049_v63 = vld [vmem:[%s3962_s1 + $0x438] sm:$0xff] }
  0xaf   : > { %2756 = vmatpush3.bf16.msra.mxu1 %v3560_v34  ;;  %1424 = vmatprep.mubr.f32.mxu0 %v3410_v27  ;;  %v2728_v27 = vpack.c.bf16 %v1049_v63, %v1048_v12 }
  0xb0   : > { %1569 = vmatprep.mubr.f32.mxu1 %v3450_v43  ;;  %2721 = vmatprep.subr.bf16.mxu0 %v2720_v3 }
  0xb1   : > { %1425 = vmatmul.mubr.f32.gmra.mrb[34].mxu0 %v3376_v14  ;;  %2749 = vmatprep.subr.bf16.mxu1 %v2720_v3  ;;  %v1050_v14 = vld [vmem:[%s3962_s1 + $0x440] sm:$0xff] }
  0xb2   : > { %1570 = vmatmul.mubr.f32.gmra.mrb[34].mxu1 %v3379_v15  ;;  %1429 = vmatprep.mubr.f32.mxu0 %v3447_v42  ;;  %v2732_v15 = vpack.c.bf16 %v1051_v6, %v1050_v14 }
  0xb3   : > { %1574 = vmatprep.mubr.f32.mxu1 %v3487_v58  ;;  %2723 = vmatpush3.bf16.msra.mxu0 %v2720_v3 }
  0xb4   : > { %2757 = vmatpush3.bf16.msra.mxu1 %v2720_v3  ;;  %2725 = vmatprep.subr.bf16.mxu0 %v2724_v62 }
  0xb5   : > { %1430 = vmatmul.mubr.f32.gmra.mrb[36].mxu0 %v3413_v28  ;;  %2750 = vmatprep.subr.bf16.mxu1 %v2724_v62  ;;  %v1052_v28 = vld [vmem:[%s3962_s1 + $0x450] sm:$0xff] }
  0xb6   : > { %1575 = vmatmul.mubr.f32.gmra.mrb[36].mxu1 %v3416_v29  ;;  %1434 = vmatprep.mubr.f32.mxu0 %v3484_v57  ;;  %v2736_v29 = vpack.c.bf16 %v1053_v7, %v1052_v28 }
  0xb7   : > { %1579 = vmatprep.mubr.f32.mxu1 %v3524_v11  ;;  %2727 = vmatpush3.bf16.msra.mxu0 %v2724_v62 }
  0xb8   : > { %2758 = vmatpush3.bf16.msra.mxu1 %v2724_v62  ;;  %2729 = vmatprep.subr.bf16.mxu0 %v2728_v27 }
  0xb9   : > { %1435 = vmatmul.mubr.f32.gmra.mrb[38].mxu0 %v3450_v43  ;;  %2751 = vmatprep.subr.bf16.mxu1 %v2728_v27  ;;  %v1054_v43 = vld [vmem:[%s3962_s1 + $0x460] sm:$0xff] }
  0xba   : > { %1580 = vmatmul.mubr.f32.gmra.mrb[38].mxu1 %v3453_v44  ;;  %1439 = vmatprep.mubr.f32.mxu0 %v3521_v10  ;;  %v2740_v44 = vpack.c.bf16 %v1055_v8, %v1054_v43 }
  0xbb   : > { %1584 = vmatprep.mubr.f32.mxu1 %v3555_v30  ;;  %2731 = vmatpush3.bf16.msra.mxu0 %v2728_v27 }
  0xbc   : > { %2759 = vmatpush3.bf16.msra.mxu1 %v2728_v27  ;;  %2733 = vmatprep.subr.bf16.mxu0 %v2732_v15 }
  0xbd   : > { %1440 = vmatmul.mubr.f32.gmra.mrb[40].mxu0 %v3487_v58  ;;  %2752 = vmatprep.subr.bf16.mxu1 %v2732_v15  ;;  %v1056_v58 = vld [vmem:[%s3962_s1 + $0x470] sm:$0xff] }
  0xbe   : > { %1585 = vmatmul.mubr.f32.gmra.mrb[40].mxu1 %v3490_v60  ;;  %1444 = vmatprep.mubr.f32.mxu0 %v3552_v26  ;;  %v2744_v60 = vpack.c.bf16 %v1057_v9, %v1056_v58 }
  0xbf   : > { %1589 = vmatprep.mubr.f32.mxu1 %v3570_v36  ;;  %2735 = vmatpush3.bf16.msra.mxu0 %v2732_v15 }
  0xc0   : > { %2760 = vmatpush3.bf16.msra.mxu1 %v2732_v15  ;;  %2737 = vmatprep.subr.bf16.mxu0 %v2736_v29 }
  0xc1   : > { %1445 = vmatmul.mubr.f32.gmra.mrb[42].mxu0 %v3524_v11  ;;  %2753 = vmatprep.subr.bf16.mxu1 %v2736_v29  ;;  %v2155_v11 = vld [vmem:[%s3237_s10 + $0xc1] sm:$0xff] }
  0xc2   : > { %1590 = vmatmul.mubr.f32.gmra.mrb[42].mxu1 %v3527_v16  ;;  %1449 = vmatprep.mubr.f32.mxu0 %v3567_v35  ;;  %v2156_v16 = vld [vmem:[%s3237_s10 + $0xc9] sm:$0xff] }
  0xc3   : > { %1594 = vmatprep.mubr.f32.mxu1 %v3585_v39  ;;  %2739 = vmatpush3.bf16.msra.mxu0 %v2736_v29 }
  0xc4   : > { %2761 = vmatpush3.bf16.msra.mxu1 %v2736_v29  ;;  %2741 = vmatprep.subr.bf16.mxu0 %v2740_v44 }
  0xc5   : > { %1450 = vmatmul.mubr.f32.gmra.mrb[44].mxu0 %v3555_v30  ;;  %2754 = vmatprep.subr.bf16.mxu1 %v2740_v44 }
  0xc6   : > { %1595 = vmatmul.mubr.f32.gmra.mrb[44].mxu1 %v3558_v32  ;;  %1454 = vmatprep.mubr.f32.mxu0 %v3582_v38 }
  0xc7   : > { %1599 = vmatprep.mubr.f32.mxu1 %v3598_v45  ;;  %2743 = vmatpush3.bf16.msra.mxu0 %v2740_v44 }
  0xc8   : > { %2762 = vmatpush3.bf16.msra.mxu1 %v2740_v44  ;;  %2745 = vmatprep.subr.bf16.mxu0 %v2744_v60 }
  0xc9   : > { %1455 = vmatmul.mubr.f32.gmra.mrb[46].mxu0 %v3570_v36  ;;  %2755 = vmatprep.subr.bf16.mxu1 %v2744_v60 }
  0xca   : > { %1600 = vmatmul.mubr.f32.gmra.mrb[46].mxu1 %v3573_v37  ;;  %1459 = vmatprep.mubr.f32.mxu0 %v3595_v41 }
  0xcb   : > { %1604 = vmatprep.mubr.f32.mxu1 %v3611_v48  ;;  %2747 = vmatpush3.bf16.msra.mxu0 %v2744_v60 }
  0xcc   : > { %2763 = vmatpush3.bf16.msra.mxu1 %v2744_v60 }
  0xcd   : > { %1460 = vmatmul.mubr.f32.gmra.mrb[48].mxu0 %v3585_v39 }
  0xce   : > { %1605 = vmatmul.mubr.f32.gmra.mrb[48].mxu1 %v3588_v40  ;;  %1464 = vmatprep.mubr.f32.mxu0 %v3608_v47 }
  0xcf   : > { %1609 = vmatprep.mubr.f32.mxu1 %v3624_v51 }
  0xd1   : > { %1465 = vmatmul.mubr.f32.gmra.mrb[50].mxu0 %v3598_v45 }
  0xd2   : > { %1610 = vmatmul.mubr.f32.gmra.mrb[50].mxu1 %v3601_v46  ;;  %1469 = vmatprep.mubr.f32.mxu0 %v3621_v50 }
  0xd3   : > { %1614 = vmatprep.mubr.f32.mxu1 %v3637_v54 }
  0xd5   : > { %1470 = vmatmul.mubr.f32.gmra.mrb[52].mxu0 %v3611_v48 }
  0xd6   : > { %1615 = vmatmul.mubr.f32.gmra.mrb[52].mxu1 %v3614_v49  ;;  %1474 = vmatprep.mubr.f32.mxu0 %v3634_v53 }
  0xd7   : > { %1619 = vmatprep.mubr.f32.mxu1 %v3650_v59 }
  0xd9   : > { %1475 = vmatmul.mubr.f32.gmra.mrb[54].mxu0 %v3624_v51 }
  0xda   : > { %1620 = vmatmul.mubr.f32.gmra.mrb[54].mxu1 %v3627_v52  ;;  %1479 = vmatprep.mubr.f32.mxu0 %v3647_v56 }
  0xdb   : > { %1624 = vmatprep.mubr.f32.mxu1 %v2155_v11 }
  0xdd   : > { %1480 = vmatmul.mubr.f32.gmra.mrb[56].mxu0 %v3637_v54 }
  0xde   : > { %1625 = vmatmul.mubr.f32.gmra.mrb[56].mxu1 %v3640_v55  ;;  %1484 = vmatprep.mubr.f32.mxu0 %v3660_v0 }
  0xdf   : > { %1629 = vmatprep.mubr.f32.mxu1 %v2156_v16 }
  0xe1   : > { %1485 = vmatmul.mubr.f32.gmra.mrb[58].mxu0 %v3650_v59 }
  0xe2   : > { %1630 = vmatmul.mubr.f32.gmra.mrb[58].mxu1 %v3653_v61  ;;  %1489 = vmatprep.mubr.f32.mxu0 %v2125_v17 }
  0xe3   : > { %1634 = vmatprep.mubr.f32.mxu1 %v2157_v18 }
  0xe5   : > { %1490 = vmatmul.mubr.f32.gmra.mrb[60].mxu0 %v2155_v11 }
  0xe6   : > { %1635 = vmatmul.mubr.f32.gmra.mrb[60].mxu1 %v2141_v19  ;;  %1494 = vmatprep.mubr.f32.mxu0 %v2126_v20 }
  0xe7   : > { %1639 = vmatprep.mubr.f32.mxu1 %v2158_v21 }
  0xe9   : > { %1495 = vmatmul.mubr.f32.gmra.mrb[62].mxu0 %v2156_v16 }
  0xea   : > { %1640 = vmatmul.mubr.f32.gmra.mrb[62].mxu1 %v2142_v22  ;;  %2564 = vmatprep.mubr.f32.mxu0 %v3447_v42  ;;  %v2174_v42 = vld [vmem:[%s3237_s10 + $0xe2] sm:$0xff] }
  0xeb   : > { %2576 = vmatprep.mubr.f32.mxu1 %v3621_v50 }
  0xed   : > { %2565 = vmatmul.mubr.f32.vlgmr.msra.gmra.mrb[64].mxu0 %v3484_v57 }
  0xee   : > { %2577 = vmatmul.mubr.f32.vlgmr.msra.gmra.mrb[64].mxu1 %v3634_v53  ;;  %2567 = vmatprep.mubr.f32.mxu0 %v3521_v10 }
  0xef   : > { %2579 = vmatprep.mubr.f32.mxu1 %v3647_v56 }
  0xf1   : > { %2568 = vmatmul.mubr.f32.gmra.mrb[66].mxu0 %v3552_v26 }
  0xf2   : > { %2580 = vmatmul.mubr.f32.gmra.mrb[66].mxu1 %v3660_v0  ;;  %2570 = vmatprep.mubr.f32.mxu0 %v3567_v35 }
  0xf3   : > { %2582 = vmatprep.mubr.f32.mxu1 %v2125_v17 }
  0xf5   : > { %2571 = vmatmul.mubr.f32.gmra.mrb[68].mxu0 %v3582_v38 }
  0xf6   : > { %2583 = vmatmul.mubr.f32.gmra.mrb[68].mxu1 %v2126_v20  ;;  %2573 = vmatprep.mubr.f32.mxu0 %v3595_v41 }
  0xf7   : > { %2585 = vmatprep.mubr.f32.mxu1 %v2173_v23 }
  0xf9   : > { %2574 = vmatmul.mubr.f32.gmra.mrb[70].mxu0 %v3608_v47 }
  0xfa   : > { %2586 = vmatmul.mubr.f32.gmra.mrb[70].mxu1 %v2174_v42 }
 0x140   : > { %v2212_v57 = vpop.f32.mrb[0].mxu0 }
 0x141   : > { %v2292_v10 = vpop.f32.mrb[0].mxu1  ;;  %v2213_v25 = vpop.f32.mrb[1].mxu0 }
 0x142   : > { %v2214_v13 = vadd.f32 %v2213_v25, %v2212_v57  ;;  %v2293_v26 = vpop.f32.mrb[1].mxu1 }
 0x143   : > { %v2294_v30 = vadd.f32 %v2293_v26, %v2292_v10 }
 0x144   : > { %v1132_v31 = vadd.f32 %v2214_v13, %v3787_v24  ;;  %v2215_v32 = vpop.f32.mrb[2].mxu0 }
 0x145   : > { %v2295_v33 = vpop.f32.mrb[2].mxu1  ;;  %v2216_v34 = vpop.f32.mrb[3].mxu0 }
 0x146   : > { %v3790_v35 = vadd.f32 %v2294_v30, %v1132_v31  ;;  %v2217_v36 = vadd.f32 %v2216_v34, %v2215_v32  ;;  %v2296_v37 = vpop.f32.mrb[3].mxu1 }
 0x147   : > { %v2297_v38 = vadd.f32 %v2296_v37, %v2295_v33 }
 0x148   : > { %v1137_v39 = vadd.f32 %v2217_v36, %v3787_v24  ;;  %v2218_v40 = vpop.f32.mrb[4].mxu0 }
 0x149   : > { %v2298_v41 = vpop.f32.mrb[4].mxu1  ;;  %v2219_v45 = vpop.f32.mrb[5].mxu0 }
 0x14a   : > { %v3793_v46 = vadd.f32 %v2297_v38, %v1137_v39  ;;  %v2220_v47 = vadd.f32 %v2219_v45, %v2218_v40  ;;  %v2299_v48 = vpop.f32.mrb[5].mxu1 }
 0x14b   : > { %v2300_v49 = vadd.f32 %v2299_v48, %v2298_v41 }
 0x14c   : > { %v1142_v50 = vadd.f32 %v2220_v47, %v3787_v24  ;;  %v2221_v51 = vpop.f32.mrb[6].mxu0 }
 0x14d   : > { %v2301_v52 = vpop.f32.mrb[6].mxu1  ;;  %v2222_v53 = vpop.f32.mrb[7].mxu0 }
 0x14e   : > { %v3796_v54 = vadd.f32 %v2300_v49, %v1142_v50  ;;  %v2223_v55 = vadd.f32 %v2222_v53, %v2221_v51  ;;  %v2302_v56 = vpop.f32.mrb[7].mxu1 }
 0x14f   : > { %v2303_v59 = vadd.f32 %v2302_v56, %v2301_v52 }
 0x150   : > { %v1147_v61 = vadd.f32 %v2223_v55, %v3787_v24  ;;  %v2224_v0 = vpop.f32.mrb[8].mxu0 }
 0x151   : > { %v2304_v1 = vpop.f32.mrb[8].mxu1  ;;  %v2225_v2 = vpop.f32.mrb[9].mxu0 }
 0x152   : > { %v3799_v3 = vadd.f32 %v2303_v59, %v1147_v61  ;;  %v2226_v4 = vadd.f32 %v2225_v2, %v2224_v0  ;;  %v2305_v5 = vpop.f32.mrb[9].mxu1 }
 0x153   : > { %v2306_v62 = vadd.f32 %v2305_v5, %v2304_v1 }
 0x154   : > { %v1152_v12 = vadd.f32 %v2226_v4, %v3787_v24  ;;  %v2227_v63 = vpop.f32.mrb[10].mxu0 }
 0x155   : > { %v2307_v27 = vpop.f32.mrb[10].mxu1  ;;  %v2228_v14 = vpop.f32.mrb[11].mxu0 }
 0x156   : > { %v3802_v6 = vadd.f32 %v2306_v62, %v1152_v12  ;;  %v2229_v15 = vadd.f32 %v2228_v14, %v2227_v63  ;;  %v2308_v28 = vpop.f32.mrb[11].mxu1 }
 0x157   : > { %v2309_v7 = vadd.f32 %v2308_v28, %v2307_v27 }
 0x158   : > { %v1157_v29 = vadd.f32 %v2229_v15, %v3787_v24  ;;  %v2230_v43 = vpop.f32.mrb[12].mxu0 }
 0x159   : > { %v2310_v8 = vpop.f32.mrb[12].mxu1  ;;  %v2231_v44 = vpop.f32.mrb[13].mxu0 }
 0x15a   : > { %v3805_v58 = vadd.f32 %v2309_v7, %v1157_v29  ;;  %v2232_v9 = vadd.f32 %v2231_v44, %v2230_v43  ;;  %v2311_v60 = vpop.f32.mrb[13].mxu1 }
 0x15b   : > { %v2312_v11 = vadd.f32 %v2311_v60, %v2310_v8 }
 0x15c   : > { %v1162_v16 = vadd.f32 %v2232_v9, %v3787_v24  ;;  %v2233_v17 = vpop.f32.mrb[14].mxu0 }
 0x15d   : > { %v2313_v18 = vpop.f32.mrb[14].mxu1  ;;  %v2234_v19 = vpop.f32.mrb[15].mxu0 }
 0x15e   : > { %v3808_v20 = vadd.f32 %v2312_v11, %v1162_v16  ;;  %v2235_v21 = vadd.f32 %v2234_v19, %v2233_v17  ;;  %v2314_v22 = vpop.f32.mrb[15].mxu1 }
 0x15f   : > { %v2315_v23 = vadd.f32 %v2314_v22, %v2313_v18 }
 0x160   : > { %v1167_v42 = vadd.f32 %v2235_v21, %v3787_v24  ;;  %v2236_v57 = vpop.f32.mrb[16].mxu0 }
 0x161   : > { %v2316_v10 = vpop.f32.mrb[16].mxu1  ;;  %v2237_v25 = vpop.f32.mrb[17].mxu0 }
 0x162   : > { %v3811_v13 = vadd.f32 %v2315_v23, %v1167_v42  ;;  %v2238_v26 = vadd.f32 %v2237_v25, %v2236_v57  ;;  %v2317_v30 = vpop.f32.mrb[17].mxu1 }
 0x163   : > { %v2318_v31 = vadd.f32 %v2317_v30, %v2316_v10 }
 0x164   : > { %v1172_v32 = vadd.f32 %v2238_v26, %v3787_v24  ;;  %v2239_v33 = vpop.f32.mrb[18].mxu0 }
 0x165   : > { %v2319_v34 = vpop.f32.mrb[18].mxu1  ;;  %v2240_v36 = vpop.f32.mrb[19].mxu0 }
 0x166   : > { %v3814_v37 = vadd.f32 %v2318_v31, %v1172_v32  ;;  %v2241_v38 = vadd.f32 %v2240_v36, %v2239_v33  ;;  %v2320_v39 = vpop.f32.mrb[19].mxu1 }
 0x167   : > { %v2321_v40 = vadd.f32 %v2320_v39, %v2319_v34 }
 0x168   : > { %v1177_v41 = vadd.f32 %v2241_v38, %v3787_v24  ;;  %v2242_v45 = vpop.f32.mrb[20].mxu0 }
 0x169   : > { %v2322_v47 = vpop.f32.mrb[20].mxu1  ;;  %v2243_v48 = vpop.f32.mrb[21].mxu0 }
 0x16a   : > { %v3817_v49 = vadd.f32 %v2321_v40, %v1177_v41  ;;  %v2244_v50 = vadd.f32 %v2243_v48, %v2242_v45  ;;  %v2323_v51 = vpop.f32.mrb[21].mxu1 }
 0x16b   : > { %v2324_v52 = vadd.f32 %v2323_v51, %v2322_v47 }
 0x16c   : > { %v1182_v53 = vadd.f32 %v2244_v50, %v3787_v24  ;;  %v2245_v55 = vpop.f32.mrb[22].mxu0 }
 0x16d   : > { %v2325_v56 = vpop.f32.mrb[22].mxu1  ;;  %v2246_v59 = vpop.f32.mrb[23].mxu0 }
 0x16e   : > { %v3820_v61 = vadd.f32 %v2324_v52, %v1182_v53  ;;  %v2247_v0 = vadd.f32 %v2246_v59, %v2245_v55  ;;  %v2326_v1 = vpop.f32.mrb[23].mxu1 }
 0x16f   : > { %v2327_v2 = vadd.f32 %v2326_v1, %v2325_v56 }
 0x170   : > { %v1187_v4 = vadd.f32 %v2247_v0, %v3787_v24  ;;  %v2248_v5 = vpop.f32.mrb[24].mxu0 }
 0x171   : > { %v2328_v62 = vpop.f32.mrb[24].mxu1  ;;  %v2249_v12 = vpop.f32.mrb[25].mxu0 }
 0x172   : > { %v3823_v63 = vadd.f32 %v2327_v2, %v1187_v4  ;;  %v2250_v27 = vadd.f32 %v2249_v12, %v2248_v5  ;;  %v2329_v14 = vpop.f32.mrb[25].mxu1 }
 0x173   : > { %v2330_v15 = vadd.f32 %v2329_v14, %v2328_v62 }
 0x174   : > { %v1192_v28 = vadd.f32 %v2250_v27, %v3787_v24  ;;  %v2251_v7 = vpop.f32.mrb[26].mxu0 }
 0x175   : > { %v2331_v29 = vpop.f32.mrb[26].mxu1  ;;  %v2252_v43 = vpop.f32.mrb[27].mxu0 }
 0x176   : > { %v3826_v8 = vadd.f32 %v2330_v15, %v1192_v28  ;;  %v2253_v44 = vadd.f32 %v2252_v43, %v2251_v7  ;;  %v2332_v9 = vpop.f32.mrb[27].mxu1 }
 0x177   : > { %v2333_v60 = vadd.f32 %v2332_v9, %v2331_v29 }
 0x178   : > { %v1197_v11 = vadd.f32 %v2253_v44, %v3787_v24  ;;  %v2254_v16 = vpop.f32.mrb[28].mxu0 }
 0x179   : > { %v2334_v17 = vpop.f32.mrb[28].mxu1  ;;  %v2255_v18 = vpop.f32.mrb[29].mxu0 }
 0x17a   : > { %v3829_v19 = vadd.f32 %v2333_v60, %v1197_v11  ;;  %v2256_v21 = vadd.f32 %v2255_v18, %v2254_v16  ;;  %v2335_v22 = vpop.f32.mrb[29].mxu1 }
 0x17b   : > { %v2336_v23 = vadd.f32 %v2335_v22, %v2334_v17 }
 0x17c   : > { %v1202_v42 = vadd.f32 %v2256_v21, %v3787_v24  ;;  %v2257_v57 = vpop.f32.mrb[30].mxu0 }
 0x17d   : > { %v2337_v10 = vpop.f32.mrb[30].mxu1  ;;  %v2258_v25 = vpop.f32.mrb[31].mxu0 }
 0x17e   : > { %v3832_v26 = vadd.f32 %v2336_v23, %v1202_v42  ;;  %v2259_v30 = vadd.f32 %v2258_v25, %v2257_v57  ;;  %v2338_v31 = vpop.f32.mrb[31].mxu1 }
 0x17f   : > { %v2339_v32 = vadd.f32 %v2338_v31, %v2337_v10 }
 0x180   : > { %v1207_v33 = vadd.f32 %v2259_v30, %v3787_v24  ;;  %v2372_v34 = vpop.f32.mrb[32].mxu0 }
 0x181   : > { %v2452_v36 = vpop.f32.mrb[32].mxu1  ;;  %v2373_v38 = vpop.f32.mrb[33].mxu0 }
 0x182   : > { %v3835_v39 = vadd.f32 %v2339_v32, %v1207_v33  ;;  %v2374_v40 = vadd.f32 %v2373_v38, %v2372_v34  ;;  %v2453_v41 = vpop.f32.mrb[33].mxu1 }
 0x183   : > { %v2454_v45 = vadd.f32 %v2453_v41, %v2452_v36 }
 0x184   : > { %v1422_v47 = vadd.f32 %v2374_v40, %v3790_v35  ;;  %v2375_v48 = vpop.f32.mrb[34].mxu0 }
 0x185   : > { %v2455_v50 = vpop.f32.mrb[34].mxu1  ;;  %v2376_v51 = vpop.f32.mrb[35].mxu0 }
 0x186   : > { %v2377_v52 = vadd.f32 %v2376_v51, %v2375_v48  ;;  %v2456_v53 = vpop.f32.mrb[35].mxu1  ;;  %v3838_v55 = vadd.f32 %v2454_v45, %v1422_v47 }
 0x187   : > { %v2457_v56 = vadd.f32 %v2456_v53, %v2455_v50 }
 0x188   : > { %v1427_v24 = vadd.f32 %v2377_v52, %v3793_v46  ;;  %v2378_v59 = vpop.f32.mrb[36].mxu0 }
 0x189   : > { %v2458_v0 = vpop.f32.mrb[36].mxu1  ;;  %v2379_v1 = vpop.f32.mrb[37].mxu0 }
 0x18a   : > { %v2380_v2 = vadd.f32 %v2379_v1, %v2378_v59  ;;  %v2459_v4 = vpop.f32.mrb[37].mxu1  ;;  %v3841_v5 = vadd.f32 %v2457_v56, %v1427_v24 }
 0x18b   : > { %v2460_v62 = vadd.f32 %v2459_v4, %v2458_v0 }
 0x18c   : > { %v1432_v35 = vadd.f32 %v2380_v2, %v3796_v54  ;;  %v2381_v12 = vpop.f32.mrb[38].mxu0 }
 0x18d   : > { %v2461_v27 = vpop.f32.mrb[38].mxu1  ;;  %v2382_v14 = vpop.f32.mrb[39].mxu0 }
 0x18e   : > { %v2383_v15 = vadd.f32 %v2382_v14, %v2381_v12  ;;  %v2462_v28 = vpop.f32.mrb[39].mxu1  ;;  %v3844_v7 = vadd.f32 %v2460_v62, %v1432_v35 }
 0x18f   : > { %v2463_v29 = vadd.f32 %v2462_v28, %v2461_v27 }
 0x190   : > { %v1437_v46 = vadd.f32 %v2383_v15, %v3799_v3  ;;  %v2384_v43 = vpop.f32.mrb[40].mxu0 }
 0x191   : > { %v2464_v44 = vpop.f32.mrb[40].mxu1  ;;  %v2385_v9 = vpop.f32.mrb[41].mxu0 }
 0x192   : > { %v2386_v60 = vadd.f32 %v2385_v9, %v2384_v43  ;;  %v2465_v11 = vpop.f32.mrb[41].mxu1  ;;  %v3847_v16 = vadd.f32 %v2463_v29, %v1437_v46 }
 0x193   : > { %v2466_v17 = vadd.f32 %v2465_v11, %v2464_v44 }
 0x194   : > { %v1442_v54 = vadd.f32 %v2386_v60, %v3802_v6  ;;  %v2387_v18 = vpop.f32.mrb[42].mxu0 }
 0x195   : > { %v2467_v21 = vpop.f32.mrb[42].mxu1  ;;  %v2388_v22 = vpop.f32.mrb[43].mxu0 }
 0x196   : > { %v2389_v23 = vadd.f32 %v2388_v22, %v2387_v18  ;;  %v2468_v42 = vpop.f32.mrb[43].mxu1  ;;  %v3850_v57 = vadd.f32 %v2466_v17, %v1442_v54 }
 0x197   : > { %v2469_v10 = vadd.f32 %v2468_v42, %v2467_v21 }
 0x198   : > { %v1447_v3 = vadd.f32 %v2389_v23, %v3805_v58  ;;  %v2390_v25 = vpop.f32.mrb[44].mxu0 }
 0x199   : > { %v2470_v30 = vpop.f32.mrb[44].mxu1  ;;  %v2391_v31 = vpop.f32.mrb[45].mxu0 }
 0x19a   : > { %v2392_v32 = vadd.f32 %v2391_v31, %v2390_v25  ;;  %v2471_v33 = vpop.f32.mrb[45].mxu1  ;;  %v3853_v34 = vadd.f32 %v2469_v10, %v1447_v3 }
 0x19b   : > { %v2472_v36 = vadd.f32 %v2471_v33, %v2470_v30 }
 0x19c   : > { %v1452_v6 = vadd.f32 %v2392_v32, %v3808_v20  ;;  %v2393_v38 = vpop.f32.mrb[46].mxu0 }
 0x19d   : > { %v2473_v40 = vpop.f32.mrb[46].mxu1  ;;  %v2394_v41 = vpop.f32.mrb[47].mxu0 }
 0x19e   : > { %v2395_v45 = vadd.f32 %v2394_v41, %v2393_v38  ;;  %v2474_v47 = vpop.f32.mrb[47].mxu1  ;;  %v3856_v48 = vadd.f32 %v2472_v36, %v1452_v6 }
 0x19f   : > { %v2475_v50 = vadd.f32 %v2474_v47, %v2473_v40 }
 0x1a0   : > { %v1457_v58 = vadd.f32 %v2395_v45, %v3811_v13  ;;  %v2396_v51 = vpop.f32.mrb[48].mxu0 }
 0x1a1   : > { %v2476_v52 = vpop.f32.mrb[48].mxu1  ;;  %v2397_v53 = vpop.f32.mrb[49].mxu0 }
 0x1a2   : > { %v2398_v56 = vadd.f32 %v2397_v53, %v2396_v51  ;;  %v2477_v24 = vpop.f32.mrb[49].mxu1  ;;  %v3859_v59 = vadd.f32 %v2475_v50, %v1457_v58 }
 0x1a3   : > { %v2478_v0 = vadd.f32 %v2477_v24, %v2476_v52 }
 0x1a4   : > { %v1462_v20 = vadd.f32 %v2398_v56, %v3814_v37  ;;  %v2399_v1 = vpop.f32.mrb[50].mxu0 }
 0x1a5   : > { %v2479_v2 = vpop.f32.mrb[50].mxu1  ;;  %v2400_v4 = vpop.f32.mrb[51].mxu0 }
 0x1a6   : > { %v2401_v62 = vadd.f32 %v2400_v4, %v2399_v1  ;;  %v2480_v35 = vpop.f32.mrb[51].mxu1  ;;  %v3862_v12 = vadd.f32 %v2478_v0, %v1462_v20 }
 0x1a7   : > { %v2481_v27 = vadd.f32 %v2480_v35, %v2479_v2 }
 0x1a8   : > { %v1467_v13 = vadd.f32 %v2401_v62, %v3817_v49  ;;  %v2402_v14 = vpop.f32.mrb[52].mxu0  ;;  %v3880_v62 = vstv %s2919_s9 }
 0x1a9   : > { %v2482_v15 = vpop.f32.mrb[52].mxu1  ;;  %v2403_v28 = vpop.f32.mrb[53].mxu0 }
 0x1aa   : > { %v2404_v29 = vadd.f32 %v2403_v28, %v2402_v14  ;;  %v2483_v46 = vpop.f32.mrb[53].mxu1  ;;  %v1612_v43 = vadd.f32 %v2481_v27, %v1467_v13 }
 0x1ab   : > { %v2484_v44 = vadd.f32 %v2483_v46, %v2482_v15 }
 0x1ac   : > { %v1472_v9 = vadd.f32 %v2404_v29, %v3820_v61  ;;  %v2405_v37 = vpop.f32.mrb[54].mxu0 }
 0x1ad   : > { %v2485_v60 = vpop.f32.mrb[54].mxu1  ;;  %v2406_v11 = vpop.f32.mrb[55].mxu0 }
 0x1ae   : > { %v2407_v17 = vadd.f32 %v2406_v11, %v2405_v37  ;;  %v2486_v54 = vpop.f32.mrb[55].mxu1  ;;  %v3866_v18 = vadd.f32 %v2484_v44, %v1472_v9 }
 0x1af   : > { %v2487_v21 = vadd.f32 %v2486_v54, %v2485_v60 }
 0x1b0   : > { %v1477_v22 = vadd.f32 %v2407_v17, %v3823_v63  ;;  %v2408_v49 = vpop.f32.mrb[56].mxu0 }
 0x1b1   : > { %v2488_v23 = vpop.f32.mrb[56].mxu1  ;;  %v2409_v42 = vpop.f32.mrb[57].mxu0 }
 0x1b2   : > { %v2410_v10 = vadd.f32 %v2409_v42, %v2408_v49  ;;  %v2489_v3 = vpop.f32.mrb[57].mxu1  ;;  %v1622_v25 = vadd.f32 %v2487_v21, %v1477_v22 }
 0x1b3   : > { %v2490_v30 = vadd.f32 %v2489_v3, %v2488_v23 }
 0x1b4   : > { %v1482_v31 = vadd.f32 %v2410_v10, %v3826_v8  ;;  %v2411_v61 = vpop.f32.mrb[58].mxu0 }
 0x1b5   : > { %v2491_v32 = vpop.f32.mrb[58].mxu1  ;;  %v2412_v33 = vpop.f32.mrb[59].mxu0 }
 0x1b6   : > { %v2413_v36 = vadd.f32 %v2412_v33, %v2411_v61  ;;  %v2492_v6 = vpop.f32.mrb[59].mxu1  ;;  %v3870_v38 = vadd.f32 %v2490_v30, %v1482_v31 }
 0x1b7   : > { %v2493_v40 = vadd.f32 %v2492_v6, %v2491_v32 }
 0x1b8   : > { %v1487_v41 = vadd.f32 %v2413_v36, %v3829_v19  ;;  %v2414_v63 = vpop.f32.mrb[60].mxu0 }
 0x1b9   : > { %v2494_v45 = vpop.f32.mrb[60].mxu1  ;;  %v2415_v47 = vpop.f32.mrb[61].mxu0 }
 0x1ba   : > { %v2416_v50 = vadd.f32 %v2415_v47, %v2414_v63  ;;  %v2495_v58 = vpop.f32.mrb[61].mxu1  ;;  %v3873_v51 = vadd.f32 %v2493_v40, %v1487_v41 }
 0x1bb   : > { %v2496_v52 = vadd.f32 %v2495_v58, %v2494_v45 }
 0x1bc   : > { %v1492_v8 = vadd.f32 %v2416_v50, %v3832_v26  ;;  %v2417_v53 = vpop.f32.mrb[62].mxu0 }
 0x1bd   : > { %v2497_v56 = vpop.f32.mrb[62].mxu1  ;;  %v2418_v24 = vpop.f32.mrb[63].mxu0 }
 0x1be   : > { %v2419_v0 = vadd.f32 %v2418_v24, %v2417_v53  ;;  %v2498_v20 = vpop.f32.mrb[63].mxu1  ;;  %v3876_v1 = vadd.f32 %v2496_v52, %v1492_v8 }
 0x1bf   : > { %v2499_v2 = vadd.f32 %v2498_v20, %v2497_v56 }
 0x1c0   : > { %v1497_v19 = vadd.f32 %v2419_v0, %v3835_v39  ;;  %v2566_v4 = vpop.f32.mrb[64].mxu0 }
 0x1c1   : > { %v1717_v35 = vadd.f32 %v2566_v4, %v3841_v5  ;;  %v2578_v27 = vpop.f32.mrb[64].mxu1  ;;  %v1711_v13 = vpop.f32.mrb[65].mxu0 }
 0x1c2   : > { %v1757_v14 = vadd.f32 %v2578_v27, %v1612_v43  ;;  %v1712_v26 = vadd.f32 %v1711_v13, %v3838_v55  ;;  %v1751_v15 = vpop.f32.mrb[65].mxu1  ;;  %v3884_v28 = vadd.f32 %v2499_v2, %v1497_v19 }
 0x1c3   : > { %vm1791_vm0 = vcmp.gt.f32.partialorder %v1717_v35, 0.0  ;;  %v1808_v29 = vmul.f32 %v3880_v62, %v1717_v35  ;;  %v1752_v39 = vadd.f32 %v1751_v15, %v3862_v12 }
 0x1c4   : > { %vm1799_vm2 = vcmp.gt.f32.partialorder %v1757_v14, 0.0  ;;  %v1816_v46 = vmul.f32 %v3880_v62, %v1757_v14  ;;  %vm1790_vm3 = vcmp.gt.f32.partialorder %v1712_v26, 0.0  ;;  %v1807_v5 = vmul.f32 %v3880_v62, %v1712_v26  ;;  %v2569_v43 = vpop.f32.mrb[66].mxu0 }
 0x1c5   : > { %v1824_v55 = vsel %vm1791_vm0, %v1717_v35, %v1808_v29  ;;  %vm1798_vm4 = vcmp.gt.f32.partialorder %v1752_v39, 0.0  ;;  %v1815_v44 = vmul.f32 %v3880_v62, %v1752_v39  ;;  %v1727_v9 = vadd.f32 %v2569_v43, %v3847_v16  ;;  %v2581_v37 = vpop.f32.mrb[66].mxu1  ;;  %v1721_v60 = vpop.f32.mrb[67].mxu0 }
 0x1c6   : > { %1841 = vst.msk [vmem:[%s2917_s7 + $0x8] sm:$0xff] %vm1839_vm1, %v1824_v55  ;;  %v1832_v12 = vsel %vm1799_vm2, %v1757_v14, %v1816_v46  ;;  %v1823_v11 = vsel %vm1790_vm3, %v1712_v26, %v1807_v5  ;;  %v1767_v17 = vadd.f32 %v2581_v37, %v1622_v25  ;;  %v1722_v54 = vadd.f32 %v1721_v60, %v3844_v7  ;;  %v1761_v21 = vpop.f32.mrb[67].mxu1 }
 0x1c7   : > { %1849 = vst.msk [vmem:[%s2917_s7 + $0x48] sm:$0xff] %vm1839_vm1, %v1832_v12  ;;  %1840 = vst.msk [vmem:[%s2917_s7] sm:$0xff] %vm1839_vm1, %v1823_v11  ;;  %v1831_v22 = vsel %vm1798_vm4, %v1752_v39, %v1815_v44  ;;  %vm1793_vm5 = vcmp.gt.f32.partialorder %v1727_v9, 0.0  ;;  %v1810_v49 = vmul.f32 %v3880_v62, %v1727_v9  ;;  %v1762_v16 = vadd.f32 %v1761_v21, %v3866_v18 }
 0x1c8   : > { %1848 = vst.msk [vmem:[%s2917_s7 + $0x40] sm:$0xff] %vm1839_vm1, %v1831_v22  ;;  %vm1801_vm6 = vcmp.gt.f32.partialorder %v1767_v17, 0.0  ;;  %v1818_v23 = vmul.f32 %v3880_v62, %v1767_v17  ;;  %vm1792_vm7 = vcmp.gt.f32.partialorder %v1722_v54, 0.0  ;;  %v1809_v7 = vmul.f32 %v3880_v62, %v1722_v54  ;;  %v2572_v42 = vpop.f32.mrb[68].mxu0 }
 0x1c9   : > { %v1826_v10 = vsel %vm1793_vm5, %v1727_v9, %v1810_v49  ;;  %vm1800_vm8 = vcmp.gt.f32.partialorder %v1762_v16, 0.0  ;;  %v1817_v3 = vmul.f32 %v3880_v62, %v1762_v16  ;;  %v1737_v25 = vadd.f32 %v2572_v42, %v3853_v34  ;;  %v2584_v30 = vpop.f32.mrb[68].mxu1  ;;  %v1731_v18 = vpop.f32.mrb[69].mxu0 }
 0x1ca   : > { %1843 = vst.msk [vmem:[%s2917_s7 + $0x18] sm:$0xff] %vm1839_vm1, %v1826_v10  ;;  %v1834_v31 = vsel %vm1801_vm6, %v1767_v17, %v1818_v23  ;;  %v1825_v61 = vsel %vm1792_vm7, %v1722_v54, %v1809_v7  ;;  %v1777_v32 = vadd.f32 %v2584_v30, %v3873_v51  ;;  %v1732_v33 = vadd.f32 %v1731_v18, %v3850_v57  ;;  %v1771_v36 = vpop.f32.mrb[69].mxu1 }
 0x1cb   : > { %1851 = vst.msk [vmem:[%s2917_s7 + $0x58] sm:$0xff] %vm1839_vm1, %v1834_v31  ;;  %1842 = vst.msk [vmem:[%s2917_s7 + $0x10] sm:$0xff] %vm1839_vm1, %v1825_v61  ;;  %v1833_v6 = vsel %vm1800_vm8, %v1762_v16, %v1817_v3  ;;  %vm1795_vm9 = vcmp.gt.f32.partialorder %v1737_v25, 0.0  ;;  %v1812_v34 = vmul.f32 %v3880_v62, %v1737_v25  ;;  %v1772_v40 = vadd.f32 %v1771_v36, %v3870_v38 }
 0x1cc   : > { %1850 = vst.msk [vmem:[%s2917_s7 + $0x50] sm:$0xff] %vm1839_vm1, %v1833_v6  ;;  %vm1803_vm10 = vcmp.gt.f32.partialorder %v1777_v32, 0.0  ;;  %v1820_v41 = vmul.f32 %v3880_v62, %v1777_v32  ;;  %vm1794_vm11 = vcmp.gt.f32.partialorder %v1732_v33, 0.0  ;;  %v1811_v57 = vmul.f32 %v3880_v62, %v1732_v33  ;;  %v2575_v63 = vpop.f32.mrb[70].mxu0 }
 0x1cd   : > { %v1828_v45 = vsel %vm1795_vm9, %v1737_v25, %v1812_v34  ;;  %vm1802_vm12 = vcmp.gt.f32.partialorder %v1772_v40, 0.0  ;;  %v1819_v47 = vmul.f32 %v3880_v62, %v1772_v40  ;;  %v1747_v50 = vadd.f32 %v2575_v63, %v3859_v59  ;;  %v2587_v58 = vpop.f32.mrb[70].mxu1  ;;  %v1741_v38 = vpop.f32.mrb[71].mxu0 }
 0x1ce   : > { %1845 = vst.msk [vmem:[%s2917_s7 + $0x28] sm:$0xff] %vm1839_vm1, %v1828_v45  ;;  %v1836_v51 = vsel %vm1803_vm10, %v1777_v32, %v1820_v41  ;;  %v1827_v52 = vsel %vm1794_vm11, %v1732_v33, %v1811_v57  ;;  %v1787_v8 = vadd.f32 %v2587_v58, %v3884_v28  ;;  %v1742_v53 = vadd.f32 %v1741_v38, %v3856_v48  ;;  %v1781_v56 = vpop.f32.mrb[71].mxu1 }
 0x1cf   : > { %1853 = vst.msk [vmem:[%s2917_s7 + $0x68] sm:$0xff] %vm1839_vm1, %v1836_v51  ;;  %1844 = vst.msk [vmem:[%s2917_s7 + $0x20] sm:$0xff] %vm1839_vm1, %v1827_v52  ;;  %v1835_v24 = vsel %vm1802_vm12, %v1772_v40, %v1819_v47  ;;  %vm1797_vm13 = vcmp.gt.f32.partialorder %v1747_v50, 0.0  ;;  %v1814_v59 = vmul.f32 %v3880_v62, %v1747_v50  ;;  %v1782_v0 = vadd.f32 %v1781_v56, %v3876_v1 }
 0x1d0   : > { %1852 = vst.msk [vmem:[%s2917_s7 + $0x60] sm:$0xff] %vm1839_vm1, %v1835_v24  ;;  %vm1805_vm14 = vcmp.gt.f32.partialorder %v1787_v8, 0.0  ;;  %v1822_v48 = vmul.f32 %v3880_v62, %v1787_v8  ;;  %vm1796_vm15 = vcmp.gt.f32.partialorder %v1742_v53, 0.0  ;;  %v1813_v20 = vmul.f32 %v3880_v62, %v1742_v53 }
 0x1d1   : > { %v1830_v2 = vsel %vm1797_vm13, %v1747_v50, %v1814_v59  ;;  %vm1804_vm0 = vcmp.gt.f32.partialorder %v1782_v0, 0.0  ;;  %v1821_v19 = vmul.f32 %v3880_v62, %v1782_v0 }
 0x1d2   : > { %1847 = vst.msk [vmem:[%s2917_s7 + $0x38] sm:$0xff] %vm1839_vm1, %v1830_v2  ;;  %v1838_v4 = vsel %vm1805_vm14, %v1787_v8, %v1822_v48  ;;  %v1829_v35 = vsel %vm1796_vm15, %v1742_v53, %v1813_v20 }
 0x1d3   : > { %1855 = vst.msk [vmem:[%s2917_s7 + $0x78] sm:$0xff] %vm1839_vm1, %v1838_v4  ;;  %1846 = vst.msk [vmem:[%s2917_s7 + $0x30] sm:$0xff] %vm1839_vm1, %v1829_v35  ;;  %v1837_v1 = vsel %vm1804_vm0, %v1782_v0, %v1821_v19 }
 0x1d4   : > { %1854 = vst.msk [vmem:[%s2917_s7 + $0x70] sm:$0xff] %vm1839_vm1, %v1837_v1 }
 0x1d5 PF: > { %s15_s21 = sadd.s32 1, %s2844_s21   ;;  %s3966_s17 = smov %s2836_s19 }
 0x1d6   : > { %p12_p11 = scmp.ge.s32.totalorder %s15_s21, 6   ;;  %s3967_s18 = smov %s2840_s20 }
 0x1d7   : > { %s3968_s19 = smov %s3971_s3  ;;  %s3969_s20 = smov %s3975_s22 }
 0x1d8   :  { %14 = sbr.rel (!%p12_p11) target bundleno = 3 (0x3), region = 180 }
 0x1df   :  { %1886 = vsyncmov [#allocation4] }
 0x1e2   :  { %s1887_s7 = vpop.sfrf %1886 }
 0x1e3   :  { %p2178_p12 = scmp.ne.s32.totalorder %s1887_s7, 0 }
 0x1e5   :  { %1891 = shalt.err (%p2178_p12)  }
 0x1e6   :  { %1893 = vsyncmov [#allocation4 + $0x1] }
 0x1e9   :  { %s1894_s9 = vpop.sfrf %1893 }
 0x1ea   :  { %p2179_p13 = scmp.ne.s32.totalorder %s1894_s9, 0 }
 0x1ec   :  { %1898 = shalt.err (%p2179_p13)  }

</bundles_post_ra>
